<compile_context>
chip_gen: v5e
topology: v5e:2x2
jax: 0.10.0
libtpu: 0.0.40
codegen_flags: <defaults>
</compile_context>

<pallas_src>
import math
import jax
import jax.numpy as jnp
from jax import lax
from jax.experimental import pallas as pl
from jax.experimental.pallas import tpu as pltpu


# ----------------------------- in-kernel math -----------------------------

def _gelu(x):
    # exact (erf) GELU, matching torch.nn.GELU() default.
    # (tanh-approx GELU would move work to the EUP slot but changes numerics.)
    return 0.5 * x * (1.0 + lax.erf(x * (1.0 / math.sqrt(2.0))))


def _layernorm_cols(x, gamma, beta, eps=1e-5):
    """x: (C, M) channels-major. Normalize over channels (axis 0) per column.

    gamma/beta are per-channel (C, 1); mu/var are per-column (1, M).
    The centered tile is reused for variance and for the output.
    """
    mu = jnp.mean(x, axis=0, keepdims=True)
    xc = x - mu
    var = jnp.mean(xc * xc, axis=0, keepdims=True)
    rstd = lax.rsqrt(var + eps)
    return xc * (gamma * rstd) + beta


def _layernorm_last(x, gamma, beta, eps=1e-5):
    """Reference-side LayerNorm over the last axis."""
    mu = jnp.mean(x, axis=-1, keepdims=True)
    var = jnp.mean((x - mu) ** 2, axis=-1, keepdims=True)
    return (x - mu) * lax.rsqrt(var + eps) * gamma + beta


def embedding_block_kernel(p_ref, w1t_ref, ln1_ref, w2t_ref, p2_ref, o_ref):
    p = p_ref[0]                                                     # (Kp, TM)  K-major
    # conv1 (bias folded via the ones-row at K index K) as a PLAIN matmul,
    # producing the result channels-major so everything stays lane-dense.
    h = jnp.dot(w1t_ref[...], p, preferred_element_type=jnp.float32)  # (C1, TM)
    h = _gelu(h)
    h = _layernorm_cols(h, ln1_ref[:, 0:1], ln1_ref[:, 1:2])          # norm1 over C1
    # conv2 (1x1x1) == plain matmul, still channels-major
    z = jnp.dot(w2t_ref[...], h, preferred_element_type=jnp.float32)  # (C2, TM)
    z = z + p2_ref[:, 0:1]                                            # + b2
    z = _gelu(z)
    o_ref[0] = _layernorm_cols(z, p2_ref[:, 1:2], p2_ref[:, 2:3])     # norm2, lane-dense store


# ------------------------------ host wrapper ------------------------------

def _im2col_3d_kmajor(x, k, padding, stride, kp):
    """x: (B, Cin, D, H, W) -> patches (B, kp, Do*Ho*Wo), built in one pass.

    K order is (kd, kh, kw, cin) with cin fastest.  Row kp index K (== Cin*k^3)
    is a ones row (folds the conv1 bias); rows K+1..kp-1 are zeros.  Everything
    is produced by a single concatenate of strided slices of the NCDHW input,
    so no moveaxis / pad / at[].set() passes over the big array are needed.
    """
    B, Cin, D, H, W = x.shape
    Do = (D + 2 * padding - k) // stride + 1
    Ho = (H + 2 * padding - k) // stride + 1
    Wo = (W + 2 * padding - k) // stride + 1
    rows = Do * Ho * Wo
    K = Cin * k ** 3

    xp = jnp.pad(x, ((0, 0), (0, 0),
                     (padding, padding), (padding, padding), (padding, padding)))
    chunks = []
    for kd in range(k):
        for kh in range(k):
            for kw in range(k):
                s = xp[:, :,
                       kd:kd + stride * (Do - 1) + 1:stride,
                       kh:kh + stride * (Ho - 1) + 1:stride,
                       kw:kw + stride * (Wo - 1) + 1:stride]       # (B, Cin, Do, Ho, Wo)
                chunks.append(s.reshape(B, Cin, rows))
    # bias ones-row + zero padding rows, emitted by the same concatenate.
    chunks.append(jnp.ones((B, 1, rows), x.dtype))
    if kp > K + 1:
        chunks.append(jnp.zeros((B, kp - K - 1, rows), x.dtype))
    pat = jnp.concatenate(chunks, axis=1)                           # (B, kp, rows)
    return pat, (Do, Ho, Wo)


def _pick_tile_m(rows_im, B, tile_m):
    # lane-dense output store => multiple of 128; as large as useful.
    tile_m = max(128, min(tile_m, pl.cdiv(rows_im, 128) * 128))
    # v7x has 2 TensorCores fed by parallel grid axes: keep >= 2 total steps
    # whenever the problem allows it.
    if B * pl.cdiv(rows_im, tile_m) < 2 and rows_im > 128:
        tile_m = max(128, pl.cdiv(pl.cdiv(rows_im, 2), 128) * 128)
    return tile_m


def embedding_block(x, params, kernel_size, padding, stride, tile_m=1024):
    w1, b1, g1, be1, w2, b2, g2, be2 = params
    B, Cin = x.shape[0], x.shape[1]
    C1 = w1.shape[0]          # out_channels // 2
    C2 = w2.shape[0]          # out_channels
    k = kernel_size
    K = Cin * k ** 3

    # K (now the sublane axis of the patch tile) padded to a multiple of 8,
    # with one extra ones-row that folds the conv1 bias into the matmul.
    Kp = pl.cdiv(K + 1, 8) * 8

    pat, (Do, Ho, Wo) = _im2col_3d_kmajor(x, k, padding, stride, Kp)  # (B, Kp, rows)
    rows_im = Do * Ho * Wo

    tile_m = _pick_tile_m(rows_im, B, tile_m)
    rows_p = pl.cdiv(rows_im, tile_m) * tile_m
    if rows_p != rows_im:
        # Only triggered when tile_m does not divide the row count.
        pat = jnp.pad(pat, ((0, 0), (0, 0), (0, rows_p - rows_im)))

    # Consolidated, channels-major parameters (tiny arrays).
    w1t = jnp.transpose(w1, (0, 2, 3, 4, 1)).reshape(C1, K)   # (C1, K), K order (kd,kh,kw,cin)
    w1t = jnp.concatenate(
        [w1t, b1[:, None], jnp.zeros((C1, Kp - K - 1), w1t.dtype)], axis=1)  # (C1, Kp)
    ln1 = jnp.stack([g1, be1], axis=1)                        # (C1, 2)
    w2t = w2.reshape(C2, C1)                                  # (C2, C1)
    p2 = jnp.stack([b2, g2, be2], axis=1)                     # (C2, 3)

    grid = (B, rows_p // tile_m)

    rows_tot = B * rows_p
    cost = pl.CostEstimate(
        flops=2 * rows_tot * (Kp * C1 + C1 * C2),
        transcendentals=rows_tot * (C1 + C2 + 2),
        bytes_accessed=4 * (rows_tot * (Kp + C2) + C1 * Kp + C2 * C1 + 2 * C1 + 3 * C2),
    )

    out = pl.pallas_call(
        embedding_block_kernel,
        out_shape=jax.ShapeDtypeStruct((B, C2, rows_p), jnp.float32),
        grid_spec=pltpu.PrefetchScalarGridSpec(
            num_scalar_prefetch=0,
            grid=grid,
            in_specs=[
                pl.BlockSpec((1, Kp, tile_m), lambda b, i: (b, 0, i)),  # patches (K-major)
                pl.BlockSpec((C1, Kp), lambda b, i: (0, 0)),            # W1^T (+bias column)
                pl.BlockSpec((C1, 2), lambda b, i: (0, 0)),             # [gamma1, beta1]
                pl.BlockSpec((C2, C1), lambda b, i: (0, 0)),            # W2^T
                pl.BlockSpec((C2, 3), lambda b, i: (0, 0)),             # [b2, gamma2, beta2]
            ],
            out_specs=pl.BlockSpec((1, C2, tile_m), lambda b, i: (b, 0, i)),
        ),
        compiler_params=pltpu.CompilerParams(
            dimension_semantics=("parallel", "parallel")),
        cost_estimate=cost,
    )(pat, w1t, ln1, w2t, p2)

    # (B, C2, rows) is already NCDHW order -> plain reshape, no transpose.
    return out[:, :, :rows_im].reshape(B, C2, Do, Ho, Wo)


# --------------------------- pure-JAX reference ---------------------------

def embedding_block_ref(x, params, k, padding, stride):
    w1, b1, g1, be1, w2, b2, g2, be2 = params
    dn = ('NCDHW', 'OIDHW', 'NCDHW')
    y = lax.conv_general_dilated(
        x, w1, (stride,) * 3, [(padding, padding)] * 3, dimension_numbers=dn)
    y = y + b1[None, :, None, None, None]
    y = _gelu(y)
    y = jnp.moveaxis(y, 1, -1)
    y = _layernorm_last(y, g1, be1)
    y = jnp.moveaxis(y, -1, 1)
    z = lax.conv_general_dilated(
        y, w2, (1, 1, 1), [(0, 0)] * 3, dimension_numbers=dn)
    z = z + b2[None, :, None, None, None]
    z = _gelu(z)
    z = jnp.moveaxis(z, 1, -1)
    z = _layernorm_last(z, g2, be2)
    return jnp.moveaxis(z, -1, 1)


# ---------------------------------- main ----------------------------------

if __name__ == "__main__":
    # EmbeddingBlock(in_channels=4, out_channels=32, kernel_size=3, padding=1, stride=2)
    in_channels, out_channels = 4, 32
    kernel_size, padding, stride = 3, 1, 2
    B, D, H, W = 2, 16, 16, 16
    C1, C2 = out_channels // 2, out_channels

    key = jax.random.PRNGKey(0)
    ks = jax.random.split(key, 6)
    x = jax.random.normal(ks[0], (B, in_channels, D, H, W), jnp.float32)

    fan1 = in_channels * kernel_size ** 3
    w1 = jax.random.normal(ks[1], (C1, in_channels, kernel_size, kernel_size, kernel_size),
                           jnp.float32) * (1.0 / math.sqrt(fan1))
    b1 = jax.random.normal(ks[2], (C1,), jnp.float32) * 0.1
    w2 = jax.random.normal(ks[3], (C2, C1, 1, 1, 1), jnp.float32) * (1.0 / math.sqrt(C1))
    b2 = jax.random.normal(ks[4], (C2,), jnp.float32) * 0.1
    g1 = jnp.ones((C1,), jnp.float32)
    be1 = jnp.zeros((C1,), jnp.float32)
    g2 = jnp.ones((C2,), jnp.float32)
    be2 = jnp.zeros((C2,), jnp.float32)
    params = (w1, b1, g1, be1, w2, b2, g2, be2)

    out = embedding_block(x, params, kernel_size, padding, stride)
    out = jax.block_until_ready(out)

    ref = jax.block_until_ready(embedding_block_ref(x, params, kernel_size, padding, stride))
    assert out.shape == ref.shape, (out.shape, ref.shape)
    assert jnp.allclose(out, ref, rtol=1e-4, atol=1e-4), float(jnp.max(jnp.abs(out - ref)))

    print("KERNEL_OK")
</pallas_src>

<mosaic_0001>
module attributes {stable_mosaic.version = 11 : i64} {
  func.func @embedding_block_kernel(%arg0: i32, %arg1: i32, %arg2: memref<1x112x512xf32, #tpu.memory_space<vmem>>, %arg3: memref<16x112xf32, #tpu.memory_space<vmem>>, %arg4: memref<16x2xf32, #tpu.memory_space<vmem>>, %arg5: memref<32x16xf32, #tpu.memory_space<vmem>>, %arg6: memref<32x3xf32, #tpu.memory_space<vmem>>, %arg7: memref<1x32x512xf32, #tpu.memory_space<vmem>>) attributes {dimension_semantics = [#tpu.dimension_semantics<parallel>, #tpu.dimension_semantics<parallel>], iteration_bounds = array<i64: 2, 1>, scalar_prefetch = 0 : i64, scratch_operands = 0 : i64, tpu.core_type = #tpu.core_type<tc>, window_params = [{transform_indices = @transform_0, window_bounds = array<i64: 1, 112, 512>}, {pipeline_mode = #tpu.pipeline_mode<synchronous>, transform_indices = @transform_1, window_bounds = array<i64: 16, 112>}, {pipeline_mode = #tpu.pipeline_mode<synchronous>, transform_indices = @transform_2, window_bounds = array<i64: 16, 2>}, {pipeline_mode = #tpu.pipeline_mode<synchronous>, transform_indices = @transform_3, window_bounds = array<i64: 32, 16>}, {pipeline_mode = #tpu.pipeline_mode<synchronous>, transform_indices = @transform_4, window_bounds = array<i64: 32, 3>}, {transform_indices = @transform_5, window_bounds = array<i64: 1, 32, 512>}]} {
    %c0 = arith.constant 0 : index
    %c0_0 = arith.constant 0 : index
    %c0_1 = arith.constant 0 : index
    %0 = vector.load %arg2[%c0, %c0_0, %c0_1] : memref<1x112x512xf32, #tpu.memory_space<vmem>>, vector<1x112x512xf32>
    %1 = vector.shape_cast %0 : vector<1x112x512xf32> to vector<112x512xf32>
    %c0_2 = arith.constant 0 : index
    %c0_3 = arith.constant 0 : index
    %2 = vector.load %arg3[%c0_2, %c0_3] : memref<16x112xf32, #tpu.memory_space<vmem>>, vector<16x112xf32>
    %cst = arith.constant dense<0.000000e+00> : vector<16x512xf32>
    %3 = tpu.matmul %2, %1, %cst {dimension_numbers = #tpu.dot_dimension_numbers<[1], [0], [0], [1], [0, 0, 1, 1], [], []>} : vector<16x112xf32>, vector<112x512xf32>, vector<16x512xf32> -> vector<16x512xf32>
    %cst_4 = arith.constant 5.000000e-01 : f32
    %4 = vector.broadcast %cst_4 : f32 to vector<16x512xf32>
    %5 = arith.mulf %4, %3 : vector<16x512xf32>
    %cst_5 = arith.constant 0.707106769 : f32
    %6 = vector.broadcast %cst_5 : f32 to vector<16x512xf32>
    %7 = arith.mulf %3, %6 : vector<16x512xf32>
    %8 = math.erf %7 : vector<16x512xf32>
    %cst_6 = arith.constant 1.000000e+00 : f32
    %9 = vector.broadcast %cst_6 : f32 to vector<16x512xf32>
    %10 = arith.addf %9, %8 : vector<16x512xf32>
    %11 = arith.mulf %5, %10 : vector<16x512xf32>
    %c0_7 = arith.constant 0 : index
    %c0_8 = arith.constant 0 : index
    %12 = vector.load %arg4[%c0_7, %c0_8] : memref<16x2xf32, #tpu.memory_space<vmem>>, vector<16x1xf32>
    %c0_9 = arith.constant 0 : index
    %c1 = arith.constant 1 : index
    %13 = vector.load %arg4[%c0_9, %c1] : memref<16x2xf32, #tpu.memory_space<vmem>>, vector<16x1xf32>
    %cst_10 = arith.constant dense<0.000000e+00> : vector<512xf32>
    %14 = vector.multi_reduction <add>, %11, %cst_10 [0] : vector<16x512xf32> to vector<512xf32>
    %15 = vector.shape_cast %14 : vector<512xf32> to vector<1x512xf32>
    %cst_11 = arith.constant 1.600000e+01 : f32
    %16 = vector.broadcast %cst_11 : f32 to vector<1x512xf32>
    %17 = arith.divf %15, %16 : vector<1x512xf32>
    %18 = vector.broadcast %17 : vector<1x512xf32> to vector<16x512xf32>
    %19 = arith.subf %11, %18 : vector<16x512xf32>
    %20 = arith.mulf %19, %19 : vector<16x512xf32>
    %cst_12 = arith.constant dense<0.000000e+00> : vector<512xf32>
    %21 = vector.multi_reduction <add>, %20, %cst_12 [0] : vector<16x512xf32> to vector<512xf32>
    %22 = vector.shape_cast %21 : vector<512xf32> to vector<1x512xf32>
    %cst_13 = arith.constant 1.600000e+01 : f32
    %23 = vector.broadcast %cst_13 : f32 to vector<1x512xf32>
    %24 = arith.divf %22, %23 : vector<1x512xf32>
    %cst_14 = arith.constant 9.99999974E-6 : f32
    %25 = vector.broadcast %cst_14 : f32 to vector<1x512xf32>
    %26 = arith.addf %24, %25 : vector<1x512xf32>
    %27 = math.rsqrt %26 : vector<1x512xf32>
    %28 = vector.broadcast %12 : vector<16x1xf32> to vector<16x512xf32>
    %29 = vector.broadcast %27 : vector<1x512xf32> to vector<16x512xf32>
    %30 = arith.mulf %28, %29 : vector<16x512xf32>
    %31 = arith.mulf %19, %30 : vector<16x512xf32>
    %32 = vector.broadcast %13 : vector<16x1xf32> to vector<16x512xf32>
    %33 = arith.addf %31, %32 : vector<16x512xf32>
    %c0_15 = arith.constant 0 : index
    %c0_16 = arith.constant 0 : index
    %34 = vector.load %arg5[%c0_15, %c0_16] : memref<32x16xf32, #tpu.memory_space<vmem>>, vector<32x16xf32>
    %cst_17 = arith.constant dense<0.000000e+00> : vector<32x512xf32>
    %35 = tpu.matmul %34, %33, %cst_17 {dimension_numbers = #tpu.dot_dimension_numbers<[1], [0], [0], [1], [0, 0, 1, 1], [], []>} : vector<32x16xf32>, vector<16x512xf32>, vector<32x512xf32> -> vector<32x512xf32>
    %c0_18 = arith.constant 0 : index
    %c0_19 = arith.constant 0 : index
    %36 = vector.load %arg6[%c0_18, %c0_19] : memref<32x3xf32, #tpu.memory_space<vmem>>, vector<32x1xf32>
    %37 = vector.broadcast %36 : vector<32x1xf32> to vector<32x512xf32>
    %38 = arith.addf %35, %37 : vector<32x512xf32>
    %cst_20 = arith.constant 5.000000e-01 : f32
    %39 = vector.broadcast %cst_20 : f32 to vector<32x512xf32>
    %40 = arith.mulf %39, %38 : vector<32x512xf32>
    %cst_21 = arith.constant 0.707106769 : f32
    %41 = vector.broadcast %cst_21 : f32 to vector<32x512xf32>
    %42 = arith.mulf %38, %41 : vector<32x512xf32>
    %43 = math.erf %42 : vector<32x512xf32>
    %cst_22 = arith.constant 1.000000e+00 : f32
    %44 = vector.broadcast %cst_22 : f32 to vector<32x512xf32>
    %45 = arith.addf %44, %43 : vector<32x512xf32>
    %46 = arith.mulf %40, %45 : vector<32x512xf32>
    %c0_23 = arith.constant 0 : index
    %c1_24 = arith.constant 1 : index
    %47 = vector.load %arg6[%c0_23, %c1_24] : memref<32x3xf32, #tpu.memory_space<vmem>>, vector<32x1xf32>
    %c0_25 = arith.constant 0 : index
    %c2 = arith.constant 2 : index
    %48 = vector.load %arg6[%c0_25, %c2] : memref<32x3xf32, #tpu.memory_space<vmem>>, vector<32x1xf32>
    %cst_26 = arith.constant dense<0.000000e+00> : vector<512xf32>
    %49 = vector.multi_reduction <add>, %46, %cst_26 [0] : vector<32x512xf32> to vector<512xf32>
    %50 = vector.shape_cast %49 : vector<512xf32> to vector<1x512xf32>
    %cst_27 = arith.constant 3.200000e+01 : f32
    %51 = vector.broadcast %cst_27 : f32 to vector<1x512xf32>
    %52 = arith.divf %50, %51 : vector<1x512xf32>
    %53 = vector.broadcast %52 : vector<1x512xf32> to vector<32x512xf32>
    %54 = arith.subf %46, %53 : vector<32x512xf32>
    %55 = arith.mulf %54, %54 : vector<32x512xf32>
    %cst_28 = arith.constant dense<0.000000e+00> : vector<512xf32>
    %56 = vector.multi_reduction <add>, %55, %cst_28 [0] : vector<32x512xf32> to vector<512xf32>
    %57 = vector.shape_cast %56 : vector<512xf32> to vector<1x512xf32>
    %cst_29 = arith.constant 3.200000e+01 : f32
    %58 = vector.broadcast %cst_29 : f32 to vector<1x512xf32>
    %59 = arith.divf %57, %58 : vector<1x512xf32>
    %cst_30 = arith.constant 9.99999974E-6 : f32
    %60 = vector.broadcast %cst_30 : f32 to vector<1x512xf32>
    %61 = arith.addf %59, %60 : vector<1x512xf32>
    %62 = math.rsqrt %61 : vector<1x512xf32>
    %63 = vector.broadcast %47 : vector<32x1xf32> to vector<32x512xf32>
    %64 = vector.broadcast %62 : vector<1x512xf32> to vector<32x512xf32>
    %65 = arith.mulf %63, %64 : vector<32x512xf32>
    %66 = arith.mulf %54, %65 : vector<32x512xf32>
    %67 = vector.broadcast %48 : vector<32x1xf32> to vector<32x512xf32>
    %68 = arith.addf %66, %67 : vector<32x512xf32>
    %c0_31 = arith.constant 0 : index
    %c0_32 = arith.constant 0 : index
    %c0_33 = arith.constant 0 : index
    %69 = vector.load %arg7[%c0_31, %c0_32, %c0_33] : memref<1x32x512xf32, #tpu.memory_space<vmem>>, vector<1x32x512xf32>
    %70 = vector.shape_cast %69 : vector<1x32x512xf32> to vector<32x512xf32>
    %71 = vector.shape_cast %68 : vector<32x512xf32> to vector<1x32x512xf32>
    tpu.vector_store %arg7[%c0_31, %c0_32, %c0_33], %71 {strides = array<i32>} : memref<1x32x512xf32, #tpu.memory_space<vmem>>, vector<1x32x512xf32>,
    return
  }
  func.func @transform_0(%arg0: i32, %arg1: i32) -> (i32, i32, i32) {
    %c0_i32 = arith.constant 0 : i32
    %c0_i32_0 = arith.constant 0 : i32
    return %arg0, %c0_i32, %arg1 : i32, i32, i32
  }
  func.func @transform_1(%arg0: i32, %arg1: i32) -> (i32, i32) {
    %c0_i32 = arith.constant 0 : i32
    %c0_i32_0 = arith.constant 0 : i32
    %c0_i32_1 = arith.constant 0 : i32
    return %c0_i32, %c0_i32_0 : i32, i32
  }
  func.func @transform_2(%arg0: i32, %arg1: i32) -> (i32, i32) {
    %c0_i32 = arith.constant 0 : i32
    %c0_i32_0 = arith.constant 0 : i32
    %c0_i32_1 = arith.constant 0 : i32
    return %c0_i32, %c0_i32_0 : i32, i32
  }
  func.func @transform_3(%arg0: i32, %arg1: i32) -> (i32, i32) {
    %c0_i32 = arith.constant 0 : i32
    %c0_i32_0 = arith.constant 0 : i32
    %c0_i32_1 = arith.constant 0 : i32
    return %c0_i32, %c0_i32_0 : i32, i32
  }
  func.func @transform_4(%arg0: i32, %arg1: i32) -> (i32, i32) {
    %c0_i32 = arith.constant 0 : i32
    %c0_i32_0 = arith.constant 0 : i32
    %c0_i32_1 = arith.constant 0 : i32
    return %c0_i32, %c0_i32_0 : i32, i32
  }
  func.func @transform_5(%arg0: i32, %arg1: i32) -> (i32, i32, i32) {
    %c0_i32 = arith.constant 0 : i32
    %c0_i32_0 = arith.constant 0 : i32
    return %arg0, %c0_i32, %arg1 : i32, i32, i32
  }
}

</mosaic_0001>

<bundles_post_ra>
// kernel: tpu_custom_call.1
= control target key start
LH: loop header
LB: loop body
LE: loop exit
PB: predicated region body
PF: predicated region fallthrough
CT: control target
= control target key end

     0   :  { %10 = vsyncpa [#allocation3], 0  ;;  %s4209_s0 = inlined_call_operand.hbm [shape: f32[2,112,512], index: 0, kind: input, shape index: {}]   ;;  %s4210_s1 = inlined_call_operand.vmem [shape: f32[16,112], index: 1, kind: input, shape index: {}]   ;;  %s4211_s2 = inlined_call_operand.vmem [shape: f32[16,2], index: 2, kind: input, shape index: {}]   ;;  %s4212_s3 = inlined_call_operand.vmem [shape: f32[32,16], index: 3, kind: input, shape index: {}]   ;;  %s4213_s4 = inlined_call_operand.vmem [shape: f32[32,3], index: 4, kind: input, shape index: {}]   ;;  %s4214_s5 = inlined_call_operand.hbm [shape: f32[2,32,512], index: 5, kind: output, shape index: {}]  }
   0x1   :  { %12 = vsyncpa [#allocation3 + $0x1], 0 }
   0x2   :  { %13 = vsyncpa [#allocation4], 0 }
   0x3   :  { %15 = vsyncpa [#allocation4 + $0x1], 0  ;;  %s2541_s18 = smov 0   ;;  %s2543_s19 = smov 0  }
   0x4   :  { %s2545_s20 = smov 0   ;;  %s2547_s21 = smov 0  }
   0x5   :  { %s2549_s22 = smov 0   ;;  %s2551_s23 = smov 0  }
   0x6 LB: > { %s2174_s24 = sadd.s32 4294967295, %s2500_s23   ;;  %s2175_s25 = sadd.s32 4294967294, %s2500_s23   ;;  %s2500_s23 = sphi %s2551_s23, %s21_s23   ;;  %s2496_s22 = sphi %s2549_s22, %s4267_s22   ;;  %s2492_s21 = sphi %s2547_s21, %s4266_s21   ;;  %s2488_s20 = sphi %s2545_s20, %s4265_s20   ;;  %s2484_s19 = sphi %s2543_s19, %s4264_s19   ;;  %s2480_s18 = sphi %s2541_s18, %s4263_s18  }
   0x7   : > { %s33_s26 = sadd.s32 1, %s2496_s22  ;;  %s42_s27 = sadd.s32 1, %s2488_s20 }
   0x8   : > { %p35_p0 = scmp.ge.s32.totalorder %s33_s26, 2  ;;  %p49_p1 = scmp.ne.s32.totalorder %s2488_s20, %s2484_s19 }
   0x9   : > { %p50_p2 = scmp.eq.s32.totalorder %s2500_s23, 0  ;;  %p55_p3 = scmp.ne.s32.totalorder %s2484_s19, %s2480_s18 }
   0xa   : > { %s4269_s26 = smov (%p35_p0, %s33_s26), 0  ;;  %p56_p5 = scmp.eq.s32.totalorder %s2174_s24, 0 }
   0xb   : > { %p2582_p4 = por %p50_p2, %p49_p1  ;;  %s37_s29 = ssub.s32 %s2496_s22, %s4269_s26 }
   0xc   : > { %p165_p6 = scmp.eq.s32.totalorder %s2174_s24, 1  ;;  %p40_p7 = scmp.eq.s32.totalorder %s37_s29, 0 }
   0xd   : > { %p2588_p8 = por %p56_p5, %p55_p3  ;;  %p171_p10 = scmp.eq.s32.totalorder %s2175_s25, 1 }
   0xe   : > { %p2592_p9 = por %p165_p6, %p49_p1  ;;  %p2177_p12 = scmp.ge.s32.totalorder %s2500_s23, 2 }
   0xf   : > { %s2597_s7 = scalar_select %p40_p7, %s2488_s20, %s42_s27  }
  0x10   : > { %p2599_p11 = por %p171_p10, %p55_p3  ;;  %p2250_p13 = scmp.lt.s32.totalorder %s2500_s23, 2 }
  0x11   : > { %s203_s9 = sand.u32 1, %s2488_s20   ;;  %s2236_s11 = smul.u32 448, %s2496_s22 }
  0x12   : > { %s2235_s10 = smul.u32 448, %s203_s9  ;;  %p2243_p0 = pnand %p2250_p13, %p2582_p4 }
  0x13   : > { %s214_s14 = scalar_lea.hbm %s4209_s0, %s2236_s11  ;;  %p2179_p1 = scmp.ge.s32.totalorder %s2500_s23, 1 }
  0x14   : > { %s207_s15 = scalar_lea.vmem [#allocation2], %s2235_s10  ;;  %s215_s17 = sshll.u32 %s214_s14, 4  ;;  %s216_s17 = int_to_ptr.hbm [resolvable:$true] %s215_s17 }
  0x15   : > { %s217_s16 = sshll.u32 %s207_s15, 4  ;;  %s204_s24 = scalar_lea.sflag [#allocation3], %s203_s9  ;;  %s218_s16 = int_to_ptr.vmem [resolvable:$true] %s217_s16 }
  0x16   : > { %s2502_s25 = smov 512   ;;  %s2503_s27 = smov 32  }
  0x17   : > { %2245 = dma.hbm_to_vmem [thread:$0]  (!%p2243_p0), %s216_s17, 7168, %s218_s16, %s204_s24, %s2502_s25, %s2502_s25, %s2503_s27  }
  0x18   : > { %p225_p2 = scmp.lt.s32.totalorder %s2500_s23, 3 }
  0x1a   : > { %p226_p3 = pnand %p2179_p1, %p225_p2 }
  0x1b   : > { %s2615_s28 = sand.u32 (!%p226_p3), 1, %s2484_s19  }
  0x1c   : > { %229 = sbr.rel (%p226_p3) target bundleno = 739 (0x2e3), region = 40  ;;  %s232_s10 = scalar_lea.sflag (!%p226_p3), [#allocation3], %s2615_s28 }
  0x1d   : > { %s2237_s29 = smul.u32 (!%p226_p3), 448, %s2615_s28 }
  0x1f   : > { %s2619_s11 = scalar_lea.vmem (!%p226_p3), [#allocation2], %s2237_s29 }
  0x21   : > { %2471 = dma.done.wait (%p2588_p8), %s232_s10, 7168  }
  0x22   : > { %2473 = vsyncadd (%p2588_p8), %s232_s10, 4294960128  ;;  %v317_v0 = vld [vmem:[%s2619_s11 + $0x1a0] sm:$0xff]  ;;  %v318_v1 = vld [vmem:[%s2619_s11 + $0x1a8] sm:$0xff]  ;;  %vm323_vm0 = vcmask 916480   ;;  %v2504_v58 = vmov 0   ;;  %v2505_v59 = vmov 1  }
  0x23   : > { %v319_v2 = vld [vmem:[%s2619_s11 + $0x1b0] sm:$0xff]  ;;  %332 = vmatpush.msra.mxu0 %v317_v0  ;;  %355 = vmatpush.msra.mxu1 %v318_v1  ;;  %v320_v3 = vld [vmem:[%s2619_s11 + $0x1b8] sm:$0xff]  ;;  %v313_v4 = vld [vmem:[%s2619_s11 + $0x180] sm:$0xff]  ;;  %s2180_s10 = sshll.u32 %s2615_s28, 7  ;;  %s2234_s30 = sshll.u32 %s2492_s21, 7 }
  0x24   : > { %v314_v5 = vld [vmem:[%s2619_s11 + $0x188] sm:$0xff]  ;;  %378 = vmatpush.msra.mxu2 %v319_v2  ;;  %401 = vmatpush.msra.mxu3 %v320_v3  ;;  %v315_v6 = vld [vmem:[%s2619_s11 + $0x190] sm:$0xff]  ;;  %v316_v7 = vld [vmem:[%s2619_s11 + $0x198] sm:$0xff]  ;;  %s2083_s13 = scalar_lea.hbm %s4214_s5, %s2234_s30  ;;  %s2070_s15 = scalar_lea.sflag [#allocation4], %s2615_s28 }
  0x25   : > { %v309_v8 = vld [vmem:[%s2619_s11 + $0x160] sm:$0xff]  ;;  %333 = vmatpush.msra.mxu0 %v313_v4  ;;  %356 = vmatpush.msra.mxu1 %v314_v5  ;;  %v310_v9 = vld [vmem:[%s2619_s11 + $0x168] sm:$0xff]  ;;  %v311_v10 = vld [vmem:[%s2619_s11 + $0x170] sm:$0xff]  ;;  %s2086_s14 = sshll.u32 %s2083_s13, 4  ;;  %s2438_s27 = scalar_lea.hbm %s4214_s5, 256  ;;  %s2087_s14 = int_to_ptr.hbm [resolvable:$true] %s2086_s14 }
  0x26   : > { %v312_v11 = vld [vmem:[%s2619_s11 + $0x178] sm:$0xff]  ;;  %379 = vmatpush.msra.mxu2 %v315_v6  ;;  %402 = vmatpush.msra.mxu3 %v316_v7  ;;  %v305_v12 = vld [vmem:[%s2619_s11 + $0x140] sm:$0xff]  ;;  %v306_v13 = vld [vmem:[%s2619_s11 + $0x148] sm:$0xff]  ;;  %s2432_s16 = sshra.s32 %s2087_s14, 4  ;;  %s2433_s16 = int_to_ptr.hbm [resolvable:$true] %s2432_s16 }
  0x27   : > { %334 = vmatpush.msra.mxu0 %v309_v8  ;;  %357 = vmatpush.msra.mxu1 %v310_v9  ;;  %v307_v14 = vld [vmem:[%s2619_s11 + $0x150] sm:$0xff]  ;;  %v308_v15 = vld [vmem:[%s2619_s11 + $0x158] sm:$0xff]  ;;  %v301_v16 = vld [vmem:[%s2619_s11 + $0x120] sm:$0xff]  ;;  %s2434_s17 = scalar_lea.hbm %s2433_s16, 128  ;;  %p2439_p7 = scmp.lt.s32.totalorder %s2433_s16, %s4214_s5 }
  0x28   : > { %380 = vmatpush.msra.mxu2 %v311_v10  ;;  %403 = vmatpush.msra.mxu3 %v312_v11  ;;  %v302_v17 = vld [vmem:[%s2619_s11 + $0x128] sm:$0xff]  ;;  %v303_v18 = vld [vmem:[%s2619_s11 + $0x130] sm:$0xff]  ;;  %v304_v19 = vld [vmem:[%s2619_s11 + $0x138] sm:$0xff]  ;;  %p2435_p4 = scmp.ne.s32.totalorder %s2433_s16, %s2434_s17  ;;  %p2440_p8 = scmp.lt.s32.totalorder %s2438_s27, %s2434_s17 }
  0x29   : > { %335 = vmatpush.msra.mxu0 %v305_v12  ;;  %358 = vmatpush.msra.mxu1 %v306_v13  ;;  %v297_v20 = vld [vmem:[%s2619_s11 + $0x100] sm:$0xff]  ;;  %v298_v21 = vld [vmem:[%s2619_s11 + $0x108] sm:$0xff]  ;;  %v299_v22 = vld [vmem:[%s2619_s11 + $0x110] sm:$0xff] }
  0x2a   : > { %381 = vmatpush.msra.mxu2 %v307_v14  ;;  %404 = vmatpush.msra.mxu3 %v308_v15  ;;  %v300_v23 = vld [vmem:[%s2619_s11 + $0x118] sm:$0xff]  ;;  %v293_v24 = vld [vmem:[%s2619_s11 + $0xe0] sm:$0xff]  ;;  %v294_v25 = vld [vmem:[%s2619_s11 + $0xe8] sm:$0xff]  ;;  %p2436_p5 = pnand %p2435_p4, %p2592_p9  ;;  %p2441_p10 = por %p2440_p8, %p2439_p7 }
  0x2b   : > { %336 = vmatpush.msra.mxu0 %v301_v16  ;;  %359 = vmatpush.msra.mxu1 %v302_v17  ;;  %v295_v26 = vld [vmem:[%s2619_s11 + $0xf0] sm:$0xff]  ;;  %v296_v27 = vld [vmem:[%s2619_s11 + $0xf8] sm:$0xff]  ;;  %v289_v28 = vld [vmem:[%s2619_s11 + $0xc0] sm:$0xff] }
  0x2c   : > { %382 = vmatpush.msra.mxu2 %v303_v18  ;;  %405 = vmatpush.msra.mxu3 %v304_v19  ;;  %v290_v29 = vld [vmem:[%s2619_s11 + $0xc8] sm:$0xff]  ;;  %v291_v30 = vld [vmem:[%s2619_s11 + $0xd0] sm:$0xff]  ;;  %v292_v31 = vld [vmem:[%s2619_s11 + $0xd8] sm:$0xff]  ;;  %p2437_p6 = pneg %p2436_p5 }
  0x2d   : > { %337 = vmatpush.msra.mxu0 %v297_v20  ;;  %360 = vmatpush.msra.mxu1 %v298_v21  ;;  %v285_v32 = vld [vmem:[%s2619_s11 + $0xa0] sm:$0xff]  ;;  %v286_v33 = vld [vmem:[%s2619_s11 + $0xa8] sm:$0xff]  ;;  %v287_v34 = vld [vmem:[%s2619_s11 + $0xb0] sm:$0xff] }
  0x2e   : > { %383 = vmatpush.msra.mxu2 %v299_v22  ;;  %406 = vmatpush.msra.mxu3 %v300_v23  ;;  %v288_v35 = vld [vmem:[%s2619_s11 + $0xb8] sm:$0xff]  ;;  %v281_v36 = vld [vmem:[%s2619_s11 + $0x80] sm:$0xff]  ;;  %v282_v37 = vld [vmem:[%s2619_s11 + $0x88] sm:$0xff]  ;;  %p2442_p13 = pnand %p2441_p10, %p2437_p6 }
  0x2f   : > { %338 = vmatpush.msra.mxu0 %v293_v24  ;;  %361 = vmatpush.msra.mxu1 %v294_v25  ;;  %v283_v38 = vld [vmem:[%s2619_s11 + $0x90] sm:$0xff]  ;;  %v284_v39 = vld [vmem:[%s2619_s11 + $0x98] sm:$0xff]  ;;  %v277_v40 = vld [vmem:[%s2619_s11 + $0x60] sm:$0xff] }
  0x30   : > { %384 = vmatpush.msra.mxu2 %v295_v26  ;;  %407 = vmatpush.msra.mxu3 %v296_v27  ;;  %v278_v41 = vld [vmem:[%s2619_s11 + $0x68] sm:$0xff]  ;;  %v279_v42 = vld [vmem:[%s2619_s11 + $0x70] sm:$0xff]  ;;  %v280_v43 = vld [vmem:[%s2619_s11 + $0x78] sm:$0xff] }
  0x31   : > { %339 = vmatpush.msra.mxu0 %v289_v28  ;;  %362 = vmatpush.msra.mxu1 %v290_v29  ;;  %v273_v44 = vld [vmem:[%s2619_s11 + $0x40] sm:$0xff]  ;;  %v274_v45 = vld [vmem:[%s2619_s11 + $0x48] sm:$0xff]  ;;  %v275_v46 = vld [vmem:[%s2619_s11 + $0x50] sm:$0xff] }
  0x32   : > { %385 = vmatpush.msra.mxu2 %v291_v30  ;;  %408 = vmatpush.msra.mxu3 %v292_v31  ;;  %v276_v47 = vld [vmem:[%s2619_s11 + $0x58] sm:$0xff]  ;;  %v269_v48 = vld [vmem:[%s2619_s11 + $0x20] sm:$0xff]  ;;  %v270_v49 = vld [vmem:[%s2619_s11 + $0x28] sm:$0xff] }
  0x33   : > { %340 = vmatpush.msra.mxu0 %v285_v32  ;;  %363 = vmatpush.msra.mxu1 %v286_v33  ;;  %v271_v50 = vld [vmem:[%s2619_s11 + $0x30] sm:$0xff]  ;;  %v272_v51 = vld [vmem:[%s2619_s11 + $0x38] sm:$0xff]  ;;  %v265_v52 = vld [vmem:[%s2619_s11] sm:$0xff] }
  0x34   : > { %386 = vmatpush.msra.mxu2 %v287_v34  ;;  %409 = vmatpush.msra.mxu3 %v288_v35  ;;  %v266_v53 = vld [vmem:[%s2619_s11 + $0x8] sm:$0xff]  ;;  %v267_v54 = vld [vmem:[%s2619_s11 + $0x10] sm:$0xff]  ;;  %v268_v55 = vld [vmem:[%s2619_s11 + $0x18] sm:$0xff]  ;;  %s4117_s11 = scalar_lea.vmem [#allocation5], %s2180_s10 }
  0x35   : > { %341 = vmatpush.msra.mxu0 %v281_v36  ;;  %364 = vmatpush.msra.mxu1 %v282_v37  ;;  %v321_v56 = vld [vmem:[%s4210_s1] sm:$0xff]  ;;  %v775_v57 = vld [vmem:[%s4211_s2 + $0x8] sm:$0xff]  ;;  %v955_v62 = vld [vmem:[%s4213_s4 + $0x10] sm:$0xff]  ;;  %s2084_s21 = sshll.u32 %s4117_s11, 4  ;;  %s2085_s21 = int_to_ptr.vmem [resolvable:$true] %s2084_s21 }
  0x36   : > { %387 = vmatpush.msra.mxu2 %v283_v38  ;;  %410 = vmatpush.msra.mxu3 %v284_v39  ;;  %v322_v60 = vld [vmem:[%s4210_s1 + $0x8] sm:$0xff]  ;;  %v774_v61 = vld [vmem:[%s4211_s2] sm:$0xff] }
  0x37   : > { %342 = vmatpush.msra.mxu0 %v277_v40  ;;  %365 = vmatpush.msra.mxu1 %v278_v41 }
  0x38   : > { %388 = vmatpush.msra.mxu2 %v279_v42  ;;  %411 = vmatpush.msra.mxu3 %v280_v43 }
  0x39   : > { %343 = vmatpush.msra.mxu0 %v273_v44  ;;  %366 = vmatpush.msra.mxu1 %v274_v45 }
  0x3a   : > { %389 = vmatpush.msra.mxu2 %v275_v46  ;;  %412 = vmatpush.msra.mxu3 %v276_v47 }
  0x3b   : > { %344 = vmatpush.msra.mxu0 %v269_v48  ;;  %367 = vmatpush.msra.mxu1 %v270_v49 }
  0x3c   : > { %390 = vmatpush.msra.mxu2 %v271_v50  ;;  %413 = vmatpush.msra.mxu3 %v272_v51 }
  0x3d   : > { %345 = vmatpush.msra.mxu0 %v265_v52  ;;  %368 = vmatpush.msra.mxu1 %v266_v53 }
  0x3e   : > { %391 = vmatpush.msra.mxu2 %v267_v54  ;;  %414 = vmatpush.msra.mxu3 %v268_v55 }
  0x3f   : > { %2181 = vmatmul.msk.f32.vlgmr.msra.gmra.mxu0 %vm323_vm0, %v321_v56  ;;  %2183 = vmatmul.msk.f32.vlgmr.msra.gmra.mxu1 %vm323_vm0, %v321_v56 }
  0x40   : > { %2185 = vmatmul.msk.f32.vlgmr.msra.gmra.mxu2 %vm323_vm0, %v321_v56  ;;  %2187 = vmatmul.msk.f32.vlgmr.msra.gmra.mxu3 %vm323_vm0, %v321_v56 }
  0x41   : > { %2309 = vset.pattern.permute.xlu0 %v2504_v58  ;;  %2310 = vset.pattern.permute.xlu1 %v2505_v59 }
  0x42   : > { %914 = vperm.xlu0 %2309, %v775_v57   ;;  %938 = vperm.xlu1 %2310, %v775_v57  }
  0x43   : > { %2311 = vset.pattern.permute.xlu2 %v2504_v58 }
  0x47   : > { %2182 = vmatmul.msk.f32.gmra.mxu0 %vm323_vm0, %v322_v60  ;;  %2184 = vmatmul.msk.f32.gmra.mxu1 %vm323_vm0, %v322_v60 }
  0x48   : > { %2186 = vmatmul.msk.f32.gmra.mxu2 %vm323_vm0, %v322_v60  ;;  %2188 = vmatmul.msk.f32.gmra.mxu3 %vm323_vm0, %v322_v60 }
  0x4a   : > { %909 = vperm.xlu0 %2309, %v774_v61   ;;  %934 = vperm.xlu1 %2310, %v774_v61  }
  0x52   : > { %2312 = vset.pattern.permute.xlu1 %v2504_v58  ;;  %969 = vperm.xlu0 %2309, %v955_v62  }
  0x5a   : > { %2314 = vset.pattern.permute.xlu0 %v2505_v59 }
  0xbc   : > { %v2706_v63 = vpop.f32.mrf.mxu0  ;;  %v2708_v0 = vpop.f32.mrf.mxu1 }
  0xbd   : > { %v2711_v1 = vmul.f32 0.70710677, %v2706_v63  ;;  %v2714_v2 = vmul.f32 0.70710677, %v2708_v0 }
  0xbf   : > { %v438_v3 = vmul.f32 %v2711_v1, %v2711_v1  ;;  %v478_v4 = vmul.f32 %v2714_v2, %v2714_v2 }
  0xc1   : > { %v2720_v5 = vmin.f32 %v438_v3, 16.0  ;;  %v2722_v6 = vmin.f32 %v478_v4, 16.0 }
  0xc3   : > { %v440_v7 = vmul.f32 2.1237322e-06, %v2720_v5  ;;  %v451_v8 = vmul.f32 3.8918573e-05, %v2720_v5  ;;  %v480_v9 = vmul.f32 2.1237322e-06, %v2722_v6  ;;  %v2727_v10 = vpop.f32.mrf.mxu2  ;;  %v2729_v11 = vpop.f32.mrf.mxu3 }
  0xc4   : > { %v491_v12 = vmul.f32 3.8918573e-05, %v2722_v6  ;;  %v2733_v13 = vmul.f32 0.70710677, %v2727_v10  ;;  %v2738_v18 = vmul.f32 0.70710677, %v2729_v11  ;;  %v2757_v41 = vpop.f32.mrf.mxu0 }
  0xc5   : > { %v441_v14 = vadd.f32 0.00028619796, %v440_v7  ;;  %v452_v15 = vadd.f32 0.001143296, %v451_v8  ;;  %v481_v21 = vadd.f32 0.00028619796, %v480_v9 }
  0xc6   : > { %v492_v16 = vadd.f32 0.001143296, %v491_v12  ;;  %v518_v17 = vmul.f32 %v2733_v13, %v2733_v13  ;;  %v558_v25 = vmul.f32 %v2738_v18, %v2738_v18  ;;  %v2763_v49 = vmul.f32 0.70710677, %v2757_v41 }
  0xc7   : > { %v442_v19 = vmul.f32 %v441_v14, %v2720_v5  ;;  %v453_v20 = vmul.f32 %v452_v15, %v2720_v5  ;;  %v482_v30 = vmul.f32 %v481_v21, %v2722_v6 }
  0xc8   : > { %v493_v22 = vmul.f32 %v492_v16, %v2722_v6  ;;  %v2743_v23 = vmin.f32 %v518_v17, 16.0  ;;  %v2752_v35 = vmin.f32 %v558_v25, 16.0  ;;  %v598_v62 = vmul.f32 %v2763_v49, %v2763_v49 }
  0xc9   : > { %v454_v24 = vadd.f32 0.014752088, %v453_v20  ;;  %v443_v28 = vadd.f32 0.0036580483, %v442_v19  ;;  %v483_v40 = vadd.f32 0.0036580483, %v482_v30 }
  0xca   : > { %v494_v26 = vadd.f32 0.014752088, %v493_v22  ;;  %v531_v27 = vmul.f32 3.8918573e-05, %v2743_v23  ;;  %v520_v32 = vmul.f32 2.1237322e-06, %v2743_v23 }
  0xcb   : > { %v455_v29 = vmul.f32 %v454_v24, %v2720_v5  ;;  %v444_v38 = vmul.f32 %v443_v28, %v2720_v5  ;;  %v571_v46 = vmul.f32 3.8918573e-05, %v2752_v35  ;;  %v484_v52 = vmul.f32 %v483_v40, %v2722_v6  ;;  %v373_v24 = vpop.f32.mrf.mxu1 }
  0xcc   : > { %v495_v31 = vmul.f32 %v494_v26, %v2722_v6  ;;  %v532_v33 = vadd.f32 0.001143296, %v531_v27  ;;  %v521_v43 = vadd.f32 0.00028619796, %v520_v32  ;;  %v560_v57 = vmul.f32 2.1237322e-06, %v2752_v35 }
  0xcd   : > { %v456_v34 = vadd.f32 0.112945676, %v455_v29  ;;  %v445_v50 = vadd.f32 0.05243302, %v444_v38  ;;  %v572_v58 = vadd.f32 0.001143296, %v571_v46 }
  0xce   : > { %v496_v36 = vadd.f32 0.112945676, %v495_v31  ;;  %v533_v37 = vmul.f32 %v532_v33, %v2743_v23  ;;  %v522_v54 = vmul.f32 %v521_v43, %v2743_v23  ;;  %v485_v4 = vadd.f32 0.05243302, %v484_v52 }
  0xcf   : > { %v457_v39 = vmul.f32 %v456_v34, %v2720_v5  ;;  %v446_v3 = vmul.f32 %v445_v50, %v2720_v5  ;;  %v561_v8 = vadd.f32 0.00028619796, %v560_v57  ;;  %v573_v9 = vmul.f32 %v572_v58, %v2752_v35 }
  0xd0   : > { %v497_v42 = vmul.f32 %v496_v36, %v2722_v6  ;;  %v534_v44 = vadd.f32 0.014752088, %v533_v37  ;;  %v523_v7 = vadd.f32 0.0036580483, %v522_v54  ;;  %v2781_v14 = vmin.f32 %v598_v62, 16.0 }
  0xd1   : > { %v458_v45 = vadd.f32 0.4994258, %v457_v39  ;;  %v447_v15 = vadd.f32 0.18741608, %v446_v3  ;;  %v486_v16 = vmul.f32 %v485_v4, %v2722_v6  ;;  %v562_v21 = vmul.f32 %v561_v8, %v2752_v35 }
  0xd2   : > { %v498_v47 = vadd.f32 0.4994258, %v497_v42  ;;  %v535_v48 = vmul.f32 %v534_v44, %v2743_v23  ;;  %v524_v17 = vmul.f32 %v523_v7, %v2743_v23  ;;  %v574_v22 = vadd.f32 0.014752088, %v573_v9 }
  0xd3   : > { %v459_v51 = vmul.f32 %v458_v45, %v2720_v5  ;;  %v600_v26 = vmul.f32 2.1237322e-06, %v2781_v14  ;;  %v611_v27 = vmul.f32 3.8918573e-05, %v2781_v14  ;;  %v448_v29 = vmul.f32 %v447_v15, %v2720_v5 }
  0xd4   : > { %v499_v53 = vmul.f32 %v498_v47, %v2722_v6  ;;  %v536_v55 = vadd.f32 0.112945676, %v535_v48  ;;  %v487_v30 = vadd.f32 0.18741608, %v486_v16  ;;  %v525_v31 = vadd.f32 0.05243302, %v524_v17  ;;  %v2812_v48 = vpop.f32.mrf.mxu2 }
  0xd5   : > { %v2769_v56 = vadd.f32 1.0, %v459_v51  ;;  %v2796_v32 = vmul.f32 0.70710677, %v373_v24  ;;  %v563_v34 = vadd.f32 0.0036580483, %v562_v21  ;;  %v575_v36 = vmul.f32 %v574_v22, %v2752_v35 }
  0xd6   : > { %v2772_v60 = vadd.f32 1.0, %v499_v53  ;;  %v537_v61 = vmul.f32 %v536_v55, %v2743_v23  ;;  %v601_v39 = vadd.f32 0.00028619796, %v600_v26  ;;  %v612_v40 = vadd.f32 0.001143296, %v611_v27 }
  0xd7   : > { %2319 = vrcp.f32 %v2769_v56  ;;  %v2804_v42 = vmul.f32 0.5, %v2706_v63  ;;  %v449_v43 = vadd.f32 1.1283791, %v448_v29  ;;  %v488_v5 = vmul.f32 %v487_v30, %v2722_v6 }
  0xd8   : > { %2321 = vrcp.f32 %v2772_v60  ;;  %v538_v12 = vadd.f32 0.4994258, %v537_v61  ;;  %v526_v44 = vmul.f32 %v525_v31, %v2743_v23  ;;  %v602_v45 = vmul.f32 %v601_v39, %v2781_v14 }
  0xd9   : > { %v613_v46 = vmul.f32 %v612_v40, %v2781_v14  ;;  %v638_v47 = vmul.f32 %v2796_v32, %v2796_v32  ;;  %v2815_v50 = vmul.f32 0.5, %v2708_v0  ;;  %v564_v63 = vmul.f32 %v563_v34, %v2752_v35 }
  0xda   : > { %v539_v20 = vmul.f32 %v538_v12, %v2743_v23  ;;  %v576_v51 = vadd.f32 0.112945676, %v575_v36  ;;  %v2823_v55 = vmul.f32 0.5, %v2757_v41  ;;  %v603_v57 = vadd.f32 0.0036580483, %v602_v45 }
  0xdb   : > { %v614_v53 = vadd.f32 0.014752088, %v613_v46  ;;  %v2820_v54 = vmin.f32 %v638_v47, 16.0  ;;  %v2825_v58 = vmul.f32 0.5, %v373_v24  ;;  %v2828_v0 = vmul.f32 0.70710677, %v2812_v48 }
  0xdc   : > { %v2798_v33 = vadd.f32 1.0, %v539_v20  ;;  %v450_v61 = vmul.f32 %v449_v43, %v2711_v1  ;;  %vm466_vm1 = vweird.f32 %v2769_v56  ;;  %v489_v62 = vadd.f32 1.1283791, %v488_v5 }
  0xdd   : > { %v2785_v19 = vpop.eup %2319  ;;  %v527_v3 = vadd.f32 0.18741608, %v526_v44  ;;  %v565_v4 = vadd.f32 0.05243302, %v564_v63  ;;  %v577_v7 = vmul.f32 %v576_v51, %v2752_v35  ;;  %v615_v8 = vmul.f32 %v614_v53, %v2781_v14 }
  0xde   : > { %v462_v25 = vmul.f32 %v2785_v19, %v2769_v56  ;;  %v2793_v28 = vpop.eup %2321  ;;  %2323 = vrcp.f32 %v2798_v33  ;;  %v640_v41 = vmul.f32 2.1237322e-06, %v2820_v54  ;;  %vm467_vm2 = vweird.f32 %v2785_v19 }
  0xdf   : > { %v502_v38 = vmul.f32 %v2793_v28, %v2772_v60  ;;  %v470_v12 = vand.u32 2147483647, %v2769_v56  ;;  %v472_v16 = vand.u32 2147483648, %v2769_v56  ;;  %v510_v17 = vand.u32 2147483647, %v2772_v60  ;;  %vm2850_vm4 = vmor %vm466_vm1, %vm467_vm2 }
  0xe0   : > { %v463_v37 = vsub.f32 1.0, %v462_v25  ;;  %v604_v20 = vmul.f32 %v603_v57, %v2781_v14  ;;  %v678_v21 = vmul.f32 %v2828_v0, %v2828_v0  ;;  %vm506_vm3 = vweird.f32 %v2772_v60 }
  0xe1   : > { %v503_v52 = vsub.f32 1.0, %v502_v38  ;;  %v512_v22 = vand.u32 2147483648, %v2772_v60  ;;  %v616_v24 = vadd.f32 0.112945676, %v615_v8  ;;  %v641_v25 = vadd.f32 0.00028619796, %v640_v41 }
  0xe2   : > { %v464_v6 = vmul.f32 %v2785_v19, %v463_v37  ;;  %vm507_vm5 = vweird.f32 %v2793_v28  ;;  %v528_v27 = vmul.f32 %v527_v3, %v2743_v23  ;;  %v566_v29 = vmul.f32 %v565_v4, %v2752_v35 }
  0xe3   : > { %v504_v15 = vmul.f32 %v2793_v28, %v503_v52  ;;  %v578_v30 = vadd.f32 0.4994258, %v577_v7  ;;  %v617_v36 = vmul.f32 %v616_v24, %v2781_v14  ;;  %v651_v56 = vmul.f32 3.8918573e-05, %v2820_v54  ;;  %vm2873_vm7 = vmor %vm506_vm3, %vm507_vm5 }
  0xe4   : > { %v465_v9 = vadd.f32 %v2785_v19, %v464_v6  ;;  %v2839_v1 = vpop.eup %2323  ;;  %v605_v38 = vadd.f32 0.05243302, %v604_v20  ;;  %v642_v39 = vmul.f32 %v641_v25, %v2820_v54  ;;  %v2866_v23 = vmin.f32 %v678_v21, 16.0  ;;  %v2895_v21 = vpop.f32.mrf.mxu3 }
  0xe5   : > { %v505_v34 = vadd.f32 %v2793_v28, %v504_v15  ;;  %v542_v37 = vmul.f32 %v2839_v1, %v2798_v33  ;;  %vm471_vm6 = vcmp.eq.f32.partialorder %v470_v12, 8.507059e+37  ;;  %v473_v40 = vor.u32 1.1754944e-38, %v472_v16 }
  0xe6   : > { %v469_v31 = vsel %vm2850_vm4, %v2785_v19, %v465_v9  ;;  %v618_v43 = vadd.f32 0.4994258, %v617_v36  ;;  %v652_v5 = vadd.f32 0.001143296, %v651_v56  ;;  %v513_v44 = vor.u32 1.1754944e-38, %v512_v22 }
  0xe7   : > { %v529_v19 = vadd.f32 1.1283791, %v528_v27  ;;  %v567_v45 = vadd.f32 0.18741608, %v566_v29  ;;  %v579_v46 = vmul.f32 %v578_v30, %v2752_v35  ;;  %v474_v47 = vsel %vm471_vm6, %v473_v40, %v469_v31 }
  0xe8   : > { %v619_v51 = vmul.f32 %v618_v43, %v2781_v14  ;;  %v653_v6 = vmul.f32 %v652_v5, %v2820_v54  ;;  %v680_v52 = vmul.f32 2.1237322e-06, %v2866_v23  ;;  %v509_v53 = vsel %vm2873_vm7, %v2793_v28, %v505_v34 }
  0xe9   : > { %v543_v57 = vsub.f32 1.0, %v542_v37  ;;  %v606_v3 = vmul.f32 %v605_v38, %v2781_v14  ;;  %v643_v4 = vadd.f32 0.0036580483, %v642_v39  ;;  %v552_v60 = vand.u32 2147483648, %v2798_v33 }
  0xea   : > { %v2885_v7 = vadd.f32 1.0, %v619_v51  ;;  %v654_v8 = vadd.f32 0.014752088, %v653_v6  ;;  %v691_v41 = vmul.f32 3.8918573e-05, %v2866_v23  ;;  %v475_v9 = vmul.f32 %v474_v47, %v450_v61 }
  0xeb   : > { %v490_v12 = vmul.f32 %v489_v62, %v2714_v2  ;;  %vm511_vm8 = vcmp.eq.f32.partialorder %v510_v17, 8.507059e+37  ;;  %v2890_v15 = vmul.f32 %v529_v19, %v2733_v13  ;;  %v2892_v28 = vadd.f32 1.0, %v579_v46 }
  0xec   : > { %v514_v16 = vsel %vm511_vm8, %v513_v44, %v509_v53  ;;  %2325 = vrcp.f32 %v2885_v7  ;;  %v681_v20 = vadd.f32 0.00028619796, %v680_v52  ;;  %v544_v22 = vmul.f32 %v2839_v1, %v543_v57 }
  0xed   : > { %v550_v24 = vand.u32 2147483647, %v2798_v33  ;;  %v607_v25 = vadd.f32 0.18741608, %v606_v3  ;;  %v655_v61 = vmul.f32 %v654_v8, %v2820_v54  ;;  %v2900_v2 = vor.u32 1.1754944e-38, %v552_v60 }
  0xee   : > { %v568_v13 = vmul.f32 %v567_v45, %v2752_v35  ;;  %v644_v62 = vmul.f32 %v643_v4, %v2820_v54  ;;  %v692_v17 = vadd.f32 0.001143296, %v691_v41  ;;  %v2189_v26 = vclamps-f32 %v475_v9, 1.0 }
  0xef   : > { %v515_v27 = vmul.f32 %v514_v16, %v490_v12  ;;  %v656_v29 = vadd.f32 0.112945676, %v655_v61  ;;  %v2905_v30 = vmul.f32 0.70710677, %v2895_v21  ;;  %vm547_vm9 = vweird.f32 %v2839_v1 }
  0xf0   : > { %2327 = vrcp.f32 %v2892_v28  ;;  %v682_v31 = vmul.f32 %v681_v20, %v2866_v23  ;;  %v693_v34 = vmul.f32 %v692_v17, %v2866_v23  ;;  %v545_v36 = vadd.f32 %v2839_v1, %v544_v22 }
  0xf1   : > { %v608_v35 = vmul.f32 %v607_v25, %v2781_v14  ;;  %v657_v56 = vmul.f32 %v656_v29, %v2820_v54  ;;  %v718_v37 = vmul.f32 %v2905_v30, %v2905_v30  ;;  %vm546_vm10 = vweird.f32 %v2798_v33 }
  0xf2   : > { %v2326_v38 = vpop.eup %2325  ;;  %v2917_v39 = vadd.f32 1.1283791, %v568_v13  ;;  %v645_v40 = vadd.f32 0.05243302, %v644_v62  ;;  %v694_v43 = vadd.f32 0.014752088, %v693_v34  ;;  %vm2923_vm11 = vmor %vm546_vm10, %vm547_vm9  ;;  %vm626_vm14 = vweird.f32 %v2885_v7 }
  0xf3   : > { %v758_v5 = vadd.f32 1.0, %v2189_v26  ;;  %v2190_v44 = vclamps-f32 %v515_v27, 1.0  ;;  %v592_v19 = vand.u32 2147483648, %v2892_v28  ;;  %v622_v45 = vmul.f32 %v2326_v38, %v2885_v7 }
  0xf4   : > { %vm2927_vm12 = vcmp.eq.f32.partialorder %v550_v24, 8.507059e+37  ;;  %v658_v33 = vadd.f32 0.4994258, %v657_v56  ;;  %v683_v47 = vadd.f32 0.0036580483, %v682_v31  ;;  %v695_v63 = vmul.f32 %v694_v43, %v2866_v23 }
  0xf5   : > { %v2932_v51 = vmin.f32 %v718_v37, 16.0  ;;  %v549_v6 = vsel %vm2923_vm11, %v2839_v1, %v545_v36  ;;  %v609_v52 = vadd.f32 1.1283791, %v608_v35  ;;  %v623_v53 = vsub.f32 1.0, %v622_v45 }
  0xf6   : > { %v632_v57 = vand.u32 2147483648, %v2885_v7  ;;  %v2938_v3 = vpop.eup %2327  ;;  %v646_v4 = vmul.f32 %v645_v40, %v2820_v54  ;;  %v659_v60 = vmul.f32 %v658_v33, %v2820_v54  ;;  %v696_v8 = vadd.f32 0.112945676, %v695_v63 }
  0xf7   : > { %v720_v41 = vmul.f32 2.1237322e-06, %v2932_v51  ;;  %v624_v9 = vmul.f32 %v2326_v38, %v623_v53  ;;  %vm627_vm13 = vweird.f32 %v2326_v38  ;;  %v630_v12 = vand.u32 2147483647, %v2885_v7 }
  0xf8   : > { %v731_v16 = vmul.f32 3.8918573e-05, %v2932_v51  ;;  %v2945_v1 = vadd.f32 1.0, %v659_v60  ;;  %v684_v20 = vmul.f32 %v683_v47, %v2866_v23  ;;  %v697_v22 = vmul.f32 %v696_v8, %v2866_v23  ;;  %vm628_vm15 = vmor %vm626_vm14, %vm627_vm13 }
  0xf9   : > { %v721_v24 = vadd.f32 0.00028619796, %v720_v41  ;;  %v582_v25 = vmul.f32 %v2938_v3, %v2892_v28  ;;  %v625_v61 = vadd.f32 %v2326_v38, %v624_v9  ;;  %v610_v62 = vmul.f32 %v609_v52, %v2763_v49 }
  0xfa   : > { %v732_v13 = vadd.f32 0.001143296, %v731_v16  ;;  %v633_v17 = vor.u32 1.1754944e-38, %v632_v57  ;;  %v647_v26 = vadd.f32 0.18741608, %v646_v4  ;;  %2329 = vrcp.f32 %v2945_v1 }
  0xfb   : > { %v629_v27 = vsel %vm628_vm15, %v2326_v38, %v625_v61  ;;  %vm631_vm0 = vcmp.eq.f32.partialorder %v630_v12, 8.507059e+37  ;;  %v698_v29 = vadd.f32 0.4994258, %v697_v22  ;;  %v722_v31 = vmul.f32 %v721_v24, %v2932_v51 }
  0xfc   : > { %v759_v34 = vadd.f32 1.0, %v2190_v44  ;;  %v634_v36 = vsel %vm631_vm0, %v633_v17, %v629_v27  ;;  %v685_v35 = vadd.f32 0.05243302, %v684_v20  ;;  %v733_v56 = vmul.f32 %v732_v13, %v2932_v51 }
  0xfd   : > { %v554_v7 = vsel %vm2927_vm12, %v2900_v2, %v549_v6  ;;  %v583_v49 = vsub.f32 1.0, %v582_v25  ;;  %v635_v37 = vmul.f32 %v634_v36, %v610_v62  ;;  %v699_v40 = vmul.f32 %v698_v29, %v2866_v23 }
  0xfe   : > { %v648_v43 = vmul.f32 %v647_v26, %v2820_v54  ;;  %v723_v38 = vadd.f32 0.0036580483, %v722_v31  ;;  %v734_v45 = vadd.f32 0.014752088, %v733_v56  ;;  %v590_v14 = vand.u32 2147483647, %v2892_v28 }
  0xff   : > { %v2962_v33 = vor.u32 1.1754944e-38, %v592_v19  ;;  %v2193_v44 = vclamps-f32 %v635_v37, 1.0  ;;  %v2964_v47 = vadd.f32 1.0, %v699_v40  ;;  %v2967_v52 = vmul.f32 %v554_v7, %v2890_v15 }
 0x100   : > { %v2330_v63 = vpop.eup %2329  ;;  %v686_v2 = vmul.f32 %v685_v35, %v2866_v23  ;;  %v735_v46 = vmul.f32 %v734_v45, %v2932_v51  ;;  %v2506_v6 = vmov 16.0   ;;  %v2972_v54 = vmul.f32 %v758_v5, %v2804_v42 }
 0x101   : > { %2331 = vrcp.f32 %v2506_v6  ;;  %v762_v53 = vadd.f32 1.0, %v2193_v44  ;;  %v662_v19 = vmul.f32 %v2330_v63, %v2945_v1  ;;  %v2977_v57 = vmul.f32 %v759_v34, %v2815_v50 }
 0x102   : > { %2333 = vrcp.f32 %v2964_v47  ;;  %v584_v15 = vmul.f32 %v2938_v3, %v583_v49  ;;  %v649_v4 = vadd.f32 1.1283791, %v648_v43  ;;  %v724_v60 = vmul.f32 %v723_v38, %v2932_v51 }
 0x103   : > { %vm586_vm1 = vweird.f32 %v2892_v28  ;;  %vm587_vm2 = vweird.f32 %v2938_v3  ;;  %v2984_v42 = vmul.f32 %v762_v53, %v2823_v55  ;;  %v663_v5 = vsub.f32 1.0, %v662_v19 }
 0x104   : > { %v736_v8 = vadd.f32 0.112945676, %v735_v46  ;;  %v2191_v41 = vclamps-f32 %v2967_v52, 1.0  ;;  %v670_v9 = vand.u32 2147483647, %v2945_v1  ;;  %v672_v50 = vand.u32 2147483648, %v2945_v1  ;;  %vm3006_vm7 = vmor %vm586_vm1, %vm587_vm2 }
 0x105   : > { %v687_v12 = vadd.f32 0.18741608, %v686_v2  ;;  %v776_v16 = vadd.f32 %v2984_v42, %v2972_v54  ;;  %v664_v20 = vmul.f32 %v2330_v63, %v663_v5  ;;  %vm667_vm3 = vweird.f32 %v2330_v63 }
 0x106   : > { %v737_v22 = vmul.f32 %v736_v8, %v2932_v51  ;;  %v585_v55 = vadd.f32 %v2938_v3, %v584_v15  ;;  %v650_v25 = vmul.f32 %v649_v4, %v2796_v32  ;;  %vm666_vm4 = vweird.f32 %v2945_v1 }
 0x107   : > { %v2332_v24 = vpop.eup %2331  ;;  %v725_v61 = vadd.f32 0.05243302, %v724_v60  ;;  %v777_v62 = vrot.slane %v776_v16, 4  ;;  %v665_v17 = vadd.f32 %v2330_v63, %v664_v20  ;;  %vm668_vm5 = vmor %vm666_vm4, %vm667_vm3  ;;  %vm671_vm6 = vcmp.eq.f32.partialorder %v670_v9, 8.507059e+37 }
 0x108   : > { %v2334_v13 = vpop.eup %2333  ;;  %v738_v26 = vadd.f32 0.4994258, %v737_v22  ;;  %v805_v27 = vmul.f32 16.0, %v2332_v24  ;;  %v673_v29 = vor.u32 1.1754944e-38, %v672_v50  ;;  %v688_v31 = vmul.f32 %v687_v12, %v2866_v23 }
 0x109   : > { %v702_v34 = vmul.f32 %v2334_v13, %v2964_v47  ;;  %v778_v36 = vadd.f32 %v777_v62, %v776_v16  ;;  %v669_v35 = vsel %vm668_vm5, %v2330_v63, %v665_v17  ;;  %v712_v49 = vand.u32 2147483648, %v2964_v47 }
 0x10a   : > { %v739_v56 = vmul.f32 %v738_v26, %v2932_v51  ;;  %v806_v32 = vsub.f32 1.0, %v805_v27  ;;  %v674_v7 = vsel %vm671_vm6, %v673_v29, %v669_v35  ;;  %v726_v37 = vmul.f32 %v725_v61, %v2932_v51 }
 0x10b   : > { %v703_v1 = vsub.f32 1.0, %v702_v34  ;;  %v779_v40 = vrot.slane %v778_v36, 2  ;;  %v675_v43 = vmul.f32 %v674_v7, %v650_v25  ;;  %v689_v44 = vadd.f32 1.1283791, %v688_v31 }
 0x10c   : > { %v3000_v38 = vadd.f32 1.0, %v739_v56  ;;  %v807_v45 = vmul.f32 %v2332_v24, %v806_v32  ;;  %vm707_vm8 = vweird.f32 %v2334_v13  ;;  %v710_v52 = vand.u32 2147483647, %v2964_v47 }
 0x10d   : > { %v704_v63 = vmul.f32 %v2334_v13, %v703_v1  ;;  %v589_v2 = vsel %vm3006_vm7, %v2938_v3, %v585_v55  ;;  %v780_v46 = vadd.f32 %v779_v40, %v778_v36  ;;  %v2194_v6 = vclamps-f32 %v675_v43, 1.0 }
 0x10e   : > { %2335 = vrcp.f32 %v3000_v38  ;;  %vm706_vm9 = vweird.f32 %v2964_v47  ;;  %v727_v19 = vadd.f32 0.18741608, %v726_v37  ;;  %v808_v15 = vadd.f32 %v2332_v24, %v807_v45 }
 0x10f   : > { %v705_v53 = vadd.f32 %v2334_v13, %v704_v63  ;;  %v763_v4 = vadd.f32 1.0, %v2194_v6  ;;  %vm708_vm10 = vmor %vm706_vm9, %vm707_vm8  ;;  %v713_v60 = vor.u32 1.1754944e-38, %v712_v49  ;;  %v781_v5 = vrot.slane %v780_v46, 1 }
 0x110   : > { %vm809_vm11 = vweird.f32 %v2332_v24  ;;  %v690_v8 = vmul.f32 %v689_v44, %v2828_v0  ;;  %vm711_vm12 = vcmp.eq.f32.partialorder %v710_v52, 8.507059e+37  ;;  %v760_v3 = vadd.f32 1.0, %v2191_v41 }
 0x111   : > { %v709_v9 = vsel %vm708_vm10, %v2334_v13, %v705_v53  ;;  %v3017_v50 = vsel %vm809_vm11, %v2332_v24, %v808_v15  ;;  %v3020_v12 = vmul.f32 %v763_v4, %v2825_v58  ;;  %v782_v20 = vadd.f32 %v781_v5, %v780_v46 }
 0x112   : > { %v714_v16 = vsel %vm711_vm12, %v713_v60, %v709_v9  ;;  %vm591_vm13 = vcmp.eq.f32.partialorder %v590_v14, 8.507059e+37  ;;  %v728_v22 = vmul.f32 %v727_v19, %v2932_v51  ;;  %v424_v25 = vmul.f32 0.5, %v2727_v10 }
 0x113   : > { %v715_v47 = vmul.f32 %v714_v16, %v690_v8  ;;  %v594_v0 = vsel %vm591_vm13, %v2962_v33, %v589_v2  ;;  %v783_v24 = vadd.f32 %v3020_v12, %v2977_v57  ;;  %v811_v41 = vmul.f32 %v3017_v50, %v782_v20 }
 0x114   : > { %v2336_v55 = vpop.eup %2335  ;;  %v570_v58 = vmul.f32 %v2917_v39, %v2738_v18  ;;  %v428_v61 = vmul.f32 0.5, %v2812_v48  ;;  %v3034_v13 = vmul.f32 %v760_v3, %v424_v25  ;;  %v729_v26 = vadd.f32 1.1283791, %v728_v22 }
 0x115   : > { %v2195_v28 = vclamps-f32 %v715_v47, 1.0  ;;  %v742_v14 = vmul.f32 %v2336_v55, %v3000_v38  ;;  %v784_v51 = vrot.slane %v783_v24, 4  ;;  %v3037_v10 = vsub.f32 %v2972_v54, %v811_v41 }
 0x116   : > { %v3040_v33 = vsub.f32 %v2984_v42, %v811_v41  ;;  %v595_v62 = vmul.f32 %v594_v0, %v570_v58  ;;  %v752_v18 = vand.u32 2147483648, %v3000_v38  ;;  %vm747_vm14 = vweird.f32 %v2336_v55 }
 0x117   : > { %v764_v17 = vadd.f32 1.0, %v2195_v28  ;;  %v743_v27 = vsub.f32 1.0, %v742_v14  ;;  %v785_v29 = vadd.f32 %v784_v51, %v783_v24  ;;  %v823_v48 = vmul.f32 %v3037_v10, %v3037_v10 }
 0x118   : > { %v827_v39 = vmul.f32 %v3040_v33, %v3040_v33  ;;  %v750_v54 = vand.u32 2147483647, %v3000_v38  ;;  %vm746_vm15 = vweird.f32 %v3000_v38  ;;  %v2192_v32 = vclamps-f32 %v595_v62, 1.0 }
 0x119   : > { %v772_v31 = vmul.f32 %v764_v17, %v428_v61  ;;  %v744_v34 = vmul.f32 %v2336_v55, %v743_v27  ;;  %v786_v42 = vrot.slane %v785_v29, 2  ;;  %vm748_vm0 = vmor %vm746_vm15, %vm747_vm14  ;;  %v753_v1 = vor.u32 1.1754944e-38, %v752_v18 }
 0x11a   : > { %v831_v36 = vadd.f32 %v827_v39, %v823_v48  ;;  %v730_v40 = vmul.f32 %v729_v26, %v2905_v30  ;;  %vm751_vm1 = vcmp.eq.f32.partialorder %v750_v54, 8.507059e+37  ;;  %v761_v6 = vadd.f32 1.0, %v2192_v32 }
 0x11b   : > { %v790_v35 = vadd.f32 %v772_v31, %v3034_v13  ;;  %v745_v56 = vadd.f32 %v2336_v55, %v744_v34  ;;  %v787_v7 = vadd.f32 %v786_v42, %v785_v29  ;;  %v425_v4 = vmul.f32 0.5, %v2729_v11  ;;  %v3075_v42 = vpop.permute.xlu0 %914 }
 0x11c   : > { %v832_v49 = vrot.slane %v831_v36, 4  ;;  %v429_v30 = vmul.f32 0.5, %v2895_v21  ;;  %vm977_vm5 = vcmask 130048  }
 0x11d   : > { %v791_v37 = vrot.slane %v790_v35, 4  ;;  %v749_v43 = vsel %vm748_vm0, %v2336_v55, %v745_v56  ;;  %v788_v44 = vrot.slane %v787_v7, 1  ;;  %v769_v16 = vmul.f32 %v761_v6, %v425_v4 }
 0x11e   : > { %v754_v45 = vsel %vm751_vm1, %v753_v1, %v749_v43  ;;  %v833_v23 = vadd.f32 %v832_v49, %v831_v36 }
 0x11f   : > { %v792_v63 = vadd.f32 %v791_v37, %v790_v35  ;;  %v755_v52 = vmul.f32 %v754_v45, %v730_v40  ;;  %v789_v46 = vadd.f32 %v788_v44, %v787_v7  ;;  %v3079_v37 = vpop.permute.xlu1 %938 }
 0x120   : > { %v834_v2 = vrot.slane %v833_v23, 2 }
 0x121   : > { %v793_v53 = vrot.slane %v792_v63, 2  ;;  %v2196_v38 = vclamps-f32 %v755_v52, 1.0  ;;  %v812_v15 = vmul.f32 %v3017_v50, %v789_v46 }
 0x122   : > { %v835_v19 = vadd.f32 %v834_v2, %v833_v23 }
 0x123   : > { %v794_v60 = vadd.f32 %v793_v53, %v792_v63  ;;  %v765_v5 = vadd.f32 1.0, %v2196_v38  ;;  %v3055_v9 = vsub.f32 %v2977_v57, %v812_v15  ;;  %v3058_v3 = vsub.f32 %v3020_v12, %v812_v15 }
 0x124   : > { %v836_v8 = vrot.slane %v835_v19, 1 }
 0x125   : > { %v773_v20 = vmul.f32 %v765_v5, %v429_v30  ;;  %v795_v47 = vrot.slane %v794_v60, 1  ;;  %v824_v55 = vmul.f32 %v3055_v9, %v3055_v9  ;;  %v828_v11 = vmul.f32 %v3058_v3, %v3058_v3 }
 0x126   : > { %v837_v22 = vadd.f32 %v836_v8, %v835_v19  ;;  %v3089_v19 = vpop.permute.xlu0 %909 }
 0x127   : > { %v797_v25 = vadd.f32 %v773_v20, %v769_v16  ;;  %v796_v21 = vadd.f32 %v795_v47, %v794_v60  ;;  %v838_v24 = vadd.f32 %v828_v11, %v824_v55  ;;  %v3096_v55 = vpop.permute.xlu1 %934 }
 0x128   : > { %v859_v0 = vmul.f32 %v837_v22, %v3017_v50 }
 0x129   : > { %v798_v57 = vrot.slane %v797_v25, 4  ;;  %v813_v41 = vmul.f32 %v3017_v50, %v796_v21  ;;  %v839_v58 = vrot.slane %v838_v24, 4 }
 0x12a   : > { %v863_v12 = vadd.f32 1e-05, %v859_v0 }
 0x12b   : > { %v799_v61 = vadd.f32 %v798_v57, %v797_v25  ;;  %v3067_v28 = vsub.f32 %v3034_v13, %v813_v41  ;;  %v3069_v14 = vsub.f32 %v772_v31, %v813_v41  ;;  %v840_v51 = vadd.f32 %v839_v58, %v838_v24  ;;  %v3103_v57 = vld [vmem:[%s4212_s3] sm:$0xff] }
 0x12c   : > { %2337 = vrsqrt.f32 %v863_v12  ;;  %vm873_vm3 = vweird.f32 %v863_v12 }
 0x12d   : > { %v800_v62 = vrot.slane %v799_v61, 2  ;;  %v825_v17 = vmul.f32 %v3067_v28, %v3067_v28  ;;  %v829_v26 = vmul.f32 %v3069_v14, %v3069_v14  ;;  %v841_v27 = vrot.slane %v840_v51, 2 }
 0x12f   : > { %v801_v29 = vadd.f32 %v800_v62, %v799_v61  ;;  %v845_v18 = vadd.f32 %v829_v26, %v825_v17  ;;  %v842_v48 = vadd.f32 %v841_v27, %v840_v51 }
 0x131   : > { %v846_v39 = vrot.slane %v845_v18, 4  ;;  %v802_v34 = vrot.slane %v801_v29, 1  ;;  %v843_v13 = vrot.slane %v842_v48, 1 }
 0x132   : > { %v2338_v54 = vpop.eup %2337 }
 0x133   : > { %v868_v31 = vmul.f32 %v2338_v54, %v863_v12  ;;  %v847_v36 = vadd.f32 %v846_v39, %v845_v18  ;;  %v803_v35 = vadd.f32 %v802_v34, %v801_v29  ;;  %v844_v56 = vadd.f32 %v843_v13, %v842_v48  ;;  %v3113_v34 = vld [vmem:[%s4212_s3 + $0x8] sm:$0xff] }
 0x134   : > { %vm874_vm2 = vweird.f32 %v2338_v54 }
 0x135   : > { %v869_v32 = vmul.f32 %v2338_v54, %v868_v31  ;;  %v848_v7 = vrot.slane %v847_v36, 2  ;;  %v814_v1 = vmul.f32 %v3017_v50, %v803_v35  ;;  %v860_v49 = vmul.f32 %v844_v56, %v3017_v50  ;;  %vm875_vm4 = vmor %vm873_vm3, %vm874_vm2 }
 0x137   : > { %v870_v40 = vmul.f32 0.5, %v869_v32  ;;  %v849_v43 = vadd.f32 %v848_v7, %v847_v36  ;;  %v3081_v45 = vsub.f32 %v769_v16, %v814_v1  ;;  %v3083_v23 = vsub.f32 %v773_v20, %v814_v1 }
 0x138   : > { %v864_v44 = vadd.f32 1e-05, %v860_v49 }
 0x139   : > { %v871_v63 = vsub.f32 1.5, %v870_v40  ;;  %v850_v52 = vrot.slane %v849_v43, 1  ;;  %v826_v2 = vmul.f32 %v3081_v45, %v3081_v45  ;;  %v830_v46 = vmul.f32 %v3083_v23, %v3083_v23 }
 0x13a   : > { %2339 = vrsqrt.f32 %v864_v44  ;;  %vm883_vm7 = vweird.f32 %v864_v44 }
 0x13b   : > { %v872_v6 = vmul.f32 %v2338_v54, %v871_v63  ;;  %v851_v53 = vadd.f32 %v850_v52, %v849_v43  ;;  %v852_v38 = vadd.f32 %v830_v46, %v826_v2 }
 0x13d   : > { %v876_v15 = vsel %vm875_vm4, %v2338_v54, %v872_v6  ;;  %v861_v4 = vmul.f32 %v851_v53, %v3017_v50  ;;  %v853_v60 = vrot.slane %v852_v38, 4 }
 0x13e   : > { %v921_v30 = vmul.f32 %v3075_v42, %v876_v15  ;;  %v917_v5 = vmul.f32 %v3089_v19, %v876_v15  ;;  %v3151_v15 = vld [vmem:[%s4213_s4 + $0x18] sm:$0xff] }
 0x13f   : > { %v865_v8 = vadd.f32 1e-05, %v861_v4  ;;  %v854_v16 = vadd.f32 %v853_v60, %v852_v38  ;;  %v3146_v38 = vld [vmem:[%s4213_s4] sm:$0xff]  ;;  %974 = vperm.xlu1 %2312, %v3151_v15  }
 0x140   : > { %v2340_v20 = vpop.eup %2339  ;;  %v929_v47 = vmul.f32 %v921_v30, %v3040_v33  ;;  %v925_v22 = vmul.f32 %v917_v5, %v3037_v10  ;;  %959 = vperm.xlu2 %2311, %v3146_v38  }
 0x141   : > { %v878_v11 = vmul.f32 %v2340_v20, %v864_v44  ;;  %2341 = vrsqrt.f32 %v865_v8  ;;  %v855_v21 = vrot.slane %v854_v16, 2  ;;  %vm884_vm6 = vweird.f32 %v2340_v20 }
 0x142   : > { %v945_v25 = vadd.f32 %v3079_v37, %v929_v47  ;;  %v941_v24 = vadd.f32 %v3096_v55, %v925_v22  ;;  %vm885_vm8 = vmor %vm883_vm7, %vm884_vm6  ;;  %vm893_vm10 = vweird.f32 %v865_v8 }
 0x143   : > { %v879_v0 = vmul.f32 %v2340_v20, %v878_v11  ;;  %v856_v33 = vadd.f32 %v855_v21, %v854_v16 }
 0x144   : > { %1004 = vmatpush.msrb.mxu0 %v945_v25 }
 0x145   : > { %v880_v41 = vmul.f32 0.5, %v879_v0  ;;  %v857_v10 = vrot.slane %v856_v33, 1 }
 0x146   : > { %1005 = vmatpush.msrb.mxu0 %v941_v24 }
 0x147   : > { %v2342_v12 = vpop.eup %2341  ;;  %v881_v58 = vsub.f32 1.5, %v880_v41  ;;  %2197 = vmatmul.msk.f32.vlgmr.msrb.gmra.mxu0 %vm977_vm5, %v3103_v57  ;;  %v858_v51 = vadd.f32 %v857_v10, %v856_v33  ;;  %2315 = vset.pattern.permute.xlu1 %v2505_v59 }
 0x148   : > { %v888_v61 = vmul.f32 %v2342_v12, %v865_v8  ;;  %vm894_vm9 = vweird.f32 %v2342_v12 }
 0x149   : > { %v882_v62 = vmul.f32 %v2340_v20, %v881_v58  ;;  %v862_v26 = vmul.f32 %v858_v51, %v3017_v50  ;;  %vm895_vm11 = vmor %vm893_vm10, %vm894_vm9 }
 0x14a   : > { %v889_v17 = vmul.f32 %v2342_v12, %v888_v61 }
 0x14b   : > { %v886_v27 = vsel %vm885_vm8, %v2340_v20, %v882_v62  ;;  %v866_v39 = vadd.f32 1e-05, %v862_v26 }
 0x14c   : > { %v922_v29 = vmul.f32 %v3075_v42, %v886_v27  ;;  %v918_v18 = vmul.f32 %v3089_v19, %v886_v27  ;;  %v890_v48 = vmul.f32 0.5, %v889_v17 }
 0x14d   : > { %2343 = vrsqrt.f32 %v866_v39  ;;  %vm903_vm13 = vweird.f32 %v866_v39 }
 0x14e   : > { %v930_v54 = vmul.f32 %v922_v29, %v3058_v3  ;;  %v926_v13 = vmul.f32 %v918_v18, %v3055_v9  ;;  %v891_v31 = vsub.f32 1.5, %v890_v48  ;;  %v951_v9 = vld [vmem:[%s4212_s3 + $0x10] sm:$0xff] }
 0x14f   : > { %2198 = vmatmul.msk.f32.gmra.mxu0 %vm977_vm5, %v3113_v34 }
 0x150   : > { %v946_v50 = vadd.f32 %v3079_v37, %v930_v54  ;;  %v892_v36 = vmul.f32 %v2342_v12, %v891_v31  ;;  %v942_v35 = vadd.f32 %v3096_v55, %v926_v13 }
 0x152   : > { %1033 = vmatpush.msrb.mxu1 %v946_v50  ;;  %v896_v56 = vsel %vm895_vm11, %v2342_v12, %v892_v36 }
 0x153   : > { %v923_v32 = vmul.f32 %v3075_v42, %v896_v56  ;;  %v919_v3 = vmul.f32 %v3089_v19, %v896_v56  ;;  %v2344_v7 = vpop.eup %2343 }
 0x154   : > { %1034 = vmatpush.msrb.mxu1 %v942_v35  ;;  %v898_v49 = vmul.f32 %v2344_v7, %v866_v39  ;;  %vm904_vm12 = vweird.f32 %v2344_v7 }
 0x155   : > { %2201 = vmatmul.msk.f32.vlgmr.msrb.gmra.mxu1 %vm977_vm5, %v3103_v57  ;;  %v931_v1 = vmul.f32 %v923_v32, %v3069_v14  ;;  %v927_v40 = vmul.f32 %v919_v3, %v3067_v28  ;;  %v952_v14 = vld [vmem:[%s4212_s3 + $0x18] sm:$0xff]  ;;  %vm905_vm14 = vmor %vm903_vm13, %vm904_vm12 }
 0x156   : > { %v899_v44 = vmul.f32 %v2344_v7, %v898_v49 }
 0x157   : > { %v947_v43 = vadd.f32 %v3079_v37, %v931_v1  ;;  %2199 = vmatmul.msk.f32.gmra.mxu0 %vm977_vm5, %v951_v9  ;;  %v943_v52 = vadd.f32 %v3096_v55, %v927_v40 }
 0x158   : > { %v900_v63 = vmul.f32 0.5, %v899_v44 }
 0x159   : > { %1062 = vmatpush.msrb.mxu2 %v947_v43 }
 0x15a   : > { %v901_v2 = vsub.f32 1.5, %v900_v63 }
 0x15b   : > { %1063 = vmatpush.msrb.mxu2 %v943_v52 }
 0x15c   : > { %2205 = vmatmul.msk.f32.vlgmr.msrb.gmra.mxu2 %vm977_vm5, %v3103_v57  ;;  %v902_v28 = vmul.f32 %v2344_v7, %v901_v2 }
 0x15d   : > { %2202 = vmatmul.msk.f32.gmra.mxu1 %vm977_vm5, %v3113_v34 }
 0x15e   : > { %v906_v46 = vsel %vm905_vm14, %v2344_v7, %v902_v28 }
 0x15f   : > { %2200 = vmatmul.msk.f32.gmra.mxu0 %vm977_vm5, %v952_v14  ;;  %v924_v6 = vmul.f32 %v3075_v42, %v906_v46  ;;  %v920_v53 = vmul.f32 %v3089_v19, %v906_v46  ;;  %v3160_v42 = vld [vmem:[%s4213_s4 + $0x8] sm:$0xff] }
 0x160   : > { %1978 = vperm.xlu0 %2314, %v3160_v42   ;;  %964 = vperm.xlu2 %2311, %v3160_v42  }
 0x161   : > { %v932_v4 = vmul.f32 %v924_v6, %v3083_v23  ;;  %v928_v60 = vmul.f32 %v920_v53, %v3081_v45 }
 0x163   : > { %v948_v19 = vadd.f32 %v3079_v37, %v932_v4  ;;  %v944_v45 = vadd.f32 %v3096_v55, %v928_v60  ;;  %v3175_v37 = vld [vmem:[%s4213_s4 + $0x10] sm:$0xff] }
 0x164   : > { %2206 = vmatmul.msk.f32.gmra.mxu2 %vm977_vm5, %v3113_v34  ;;  %1982 = vperm.xlu1 %2315, %v3175_v37  }
 0x165   : > { %2203 = vmatmul.msk.f32.gmra.mxu1 %vm977_vm5, %v951_v9  ;;  %1091 = vmatpush.msrb.mxu3 %v948_v19 }
 0x167   : > { %1092 = vmatpush.msrb.mxu3 %v944_v45 }
 0x168   : > { %2209 = vmatmul.msk.f32.vlgmr.msrb.gmra.mxu3 %vm977_vm5, %v3103_v57  ;;  %2313 = vset.pattern.permute.xlu2 %v2505_v59 }
 0x169   : > { %1974 = vperm.xlu2 %2313, %v3146_v38  }
 0x16c   : > { %2207 = vmatmul.msk.f32.gmra.mxu2 %vm977_vm5, %v951_v9 }
 0x16d   : > { %2204 = vmatmul.msk.f32.gmra.mxu1 %vm977_vm5, %v952_v14 }
 0x170   : > { %2210 = vmatmul.msk.f32.gmra.mxu3 %vm977_vm5, %v3113_v34 }
 0x171   : > { %1986 = vperm.xlu2 %2313, %v3151_v15  }
 0x174   : > { %2208 = vmatmul.msk.f32.gmra.mxu2 %vm977_vm5, %v952_v14 }
 0x178   : > { %2211 = vmatmul.msk.f32.gmra.mxu3 %vm977_vm5, %v951_v9 }
 0x180   : > { %2212 = vmatmul.msk.f32.gmra.mxu3 %vm977_vm5, %v952_v14 }
 0x19a   : > { %v3188_v23 = vpop.permute.xlu2 %959 }
 0x1ba   : > { %v3198_v16 = vpop.permute.xlu2 %964 }
 0x1c4   : > { %v1007_v30 = vpop.f32.mrf.mxu0 }
 0x1c5   : > { %v3191_v5 = vadd.f32 %v1007_v30, %v3188_v23 }
 0x1c7   : > { %v3194_v8 = vmul.f32 0.70710677, %v3191_v5 }
 0x1c9   : > { %v1138_v59 = vmul.f32 %v3194_v8, %v3194_v8 }
 0x1cb   : > { %v3200_v20 = vmin.f32 %v1138_v59, 16.0 }
 0x1cc   : > { %v1010_v47 = vpop.f32.mrf.mxu0 }
 0x1cd   : > { %v1151_v22 = vmul.f32 3.8918573e-05, %v3200_v20  ;;  %v3204_v55 = vadd.f32 %v1010_v47, %v3198_v16  ;;  %v1140_v17 = vmul.f32 2.1237322e-06, %v3200_v20 }
 0x1cf   : > { %v1152_v11 = vadd.f32 0.001143296, %v1151_v22  ;;  %v3207_v25 = vmul.f32 0.70710677, %v3204_v55  ;;  %v1141_v34 = vadd.f32 0.00028619796, %v1140_v17 }
 0x1d1   : > { %v1153_v21 = vmul.f32 %v1152_v11, %v3200_v20  ;;  %v1298_v0 = vmul.f32 %v3207_v25, %v3207_v25  ;;  %v1142_v7 = vmul.f32 %v1141_v34, %v3200_v20 }
 0x1d2   : > { %v1036_v24 = vpop.f32.mrf.mxu1 }
 0x1d3   : > { %v1154_v57 = vadd.f32 0.014752088, %v1153_v21  ;;  %v3213_v33 = vadd.f32 %v1036_v24, %v3188_v23  ;;  %v3215_v41 = vmin.f32 %v1298_v0, 16.0  ;;  %v1143_v14 = vadd.f32 0.0036580483, %v1142_v7 }
 0x1d5   : > { %v3218_v10 = vmul.f32 0.70710677, %v3213_v33  ;;  %v1311_v12 = vmul.f32 3.8918573e-05, %v3215_v41  ;;  %v1155_v58 = vmul.f32 %v1154_v57, %v3200_v20  ;;  %v1300_v50 = vmul.f32 2.1237322e-06, %v3215_v41 }
 0x1d6   : > { %v1144_v30 = vmul.f32 %v1143_v14, %v3200_v20 }
 0x1d7   : > { %v1178_v61 = vmul.f32 %v3218_v10, %v3218_v10  ;;  %v1312_v51 = vadd.f32 0.001143296, %v1311_v12  ;;  %v1156_v29 = vadd.f32 0.112945676, %v1155_v58  ;;  %v1301_v49 = vadd.f32 0.00028619796, %v1300_v50 }
 0x1d8   : > { %v1145_v12 = vadd.f32 0.05243302, %v1144_v30 }
 0x1d9   : > { %v3224_v62 = vmin.f32 %v1178_v61, 16.0  ;;  %v1313_v26 = vmul.f32 %v1312_v51, %v3215_v41  ;;  %v1157_v31 = vmul.f32 %v1156_v29, %v3200_v20  ;;  %v1302_v46 = vmul.f32 %v1301_v49, %v3215_v41 }
 0x1da   : > { %v1039_v27 = vpop.f32.mrf.mxu1 }
 0x1db   : > { %v3229_v18 = vadd.f32 %v1039_v27, %v3198_v16  ;;  %v1191_v48 = vmul.f32 3.8918573e-05, %v3224_v62  ;;  %v1314_v39 = vadd.f32 0.014752088, %v1313_v26  ;;  %v1180_v36 = vmul.f32 2.1237322e-06, %v3224_v62 }
 0x1dc   : > { %v1158_v1 = vadd.f32 0.4994258, %v1157_v31  ;;  %v1303_v22 = vadd.f32 0.0036580483, %v1302_v46 }
 0x1dd   : > { %v1192_v54 = vadd.f32 0.001143296, %v1191_v48  ;;  %v3233_v13 = vmul.f32 0.70710677, %v3229_v18  ;;  %v1315_v3 = vmul.f32 %v1314_v39, %v3215_v41  ;;  %v1181_v44 = vadd.f32 0.00028619796, %v1180_v36 }
 0x1de   : > { %v1159_v28 = vmul.f32 %v1158_v1, %v3200_v20  ;;  %v1304_v58 = vmul.f32 %v1303_v22, %v3215_v41  ;;  %v1146_v48 = vmul.f32 %v1145_v12, %v3200_v20 }
 0x1df   : > { %v1193_v35 = vmul.f32 %v1192_v54, %v3224_v62  ;;  %v1338_v56 = vmul.f32 %v3233_v13, %v3233_v13  ;;  %v1065_v32 = vpop.f32.mrf.mxu2  ;;  %v1316_v52 = vadd.f32 0.112945676, %v1315_v3  ;;  %v1182_v4 = vmul.f32 %v1181_v44, %v3224_v62 }
 0x1e0   : > { %v3246_v43 = vadd.f32 %v1065_v32, %v3188_v23  ;;  %v3261_v47 = vadd.f32 1.0, %v1159_v28  ;;  %v1305_v34 = vadd.f32 0.05243302, %v1304_v58  ;;  %v1147_v7 = vadd.f32 0.18741608, %v1146_v48  ;;  %v3288_v28 = vpop.permute.xlu0 %969 }
 0x1e1   : > { %v1194_v9 = vadd.f32 0.014752088, %v1193_v35  ;;  %v3243_v40 = vmin.f32 %v1338_v56, 16.0  ;;  %v1317_v19 = vmul.f32 %v1316_v52, %v3215_v41  ;;  %v1183_v11 = vadd.f32 0.0036580483, %v1182_v4 }
 0x1e2   : > { %v3253_v53 = vmul.f32 0.70710677, %v3246_v43  ;;  %2345 = vrcp.f32 %v3261_v47  ;;  %v1306_v44 = vmul.f32 %v1305_v34, %v3215_v41  ;;  %v1148_v4 = vmul.f32 %v1147_v7, %v3200_v20  ;;  %v1042_v7 = vpop.f32.mrf.mxu1 }
 0x1e3   : > { %v1195_v63 = vmul.f32 %v1194_v9, %v3224_v62  ;;  %v1351_v2 = vmul.f32 3.8918573e-05, %v3243_v40  ;;  %v1318_v0 = vadd.f32 0.4994258, %v1317_v19  ;;  %v1184_v17 = vmul.f32 %v1183_v11, %v3224_v62 }
 0x1e4   : > { %v1218_v59 = vmul.f32 %v3253_v53, %v3253_v53  ;;  %v1340_v29 = vmul.f32 2.1237322e-06, %v3243_v40  ;;  %v1170_v58 = vand.u32 2147483647, %v3261_v47  ;;  %vm1166_vm1 = vweird.f32 %v3261_v47 }
 0x1e5   : > { %v1352_v6 = vadd.f32 0.001143296, %v1351_v2  ;;  %v1196_v60 = vadd.f32 0.112945676, %v1195_v63  ;;  %v1319_v27 = vmul.f32 %v1318_v0, %v3215_v41  ;;  %v1185_v35 = vadd.f32 0.05243302, %v1184_v17  ;;  %v1013_v63 = vpop.f32.mrf.mxu0 }
 0x1e6   : > { %v3264_v57 = vmin.f32 %v1218_v59, 16.0  ;;  %v1341_v3 = vadd.f32 0.00028619796, %v1340_v29  ;;  %v3300_v19 = vadd.f32 %v1013_v63, %v3288_v28  ;;  %v1149_v0 = vadd.f32 1.1283791, %v1148_v4 }
 0x1e7   : > { %v1353_v45 = vmul.f32 %v1352_v6, %v3243_v40  ;;  %v1197_v21 = vmul.f32 %v1196_v60, %v3224_v62  ;;  %v3278_v32 = vadd.f32 1.0, %v1319_v27  ;;  %v1186_v46 = vmul.f32 %v1185_v35, %v3224_v62 }
 0x1e8   : > { %v1231_v51 = vmul.f32 3.8918573e-05, %v3264_v57  ;;  %v3275_v36 = vpop.eup %2345  ;;  %v1220_v34 = vmul.f32 2.1237322e-06, %v3264_v57  ;;  %vm3334_vm15 = vcmp.eq.f32.partialorder %v1170_v58, 8.507059e+37  ;;  %v3350_v4 = vadd.f32 %v1042_v7, %v3288_v28 }
 0x1e9   : > { %v1354_v24 = vadd.f32 0.014752088, %v1353_v45  ;;  %v1198_v26 = vadd.f32 0.4994258, %v1197_v21  ;;  %v1162_v52 = vmul.f32 %v3275_v36, %v3261_v47  ;;  %2347 = vrcp.f32 %v3278_v32 }
 0x1ea   : > { %v1232_v50 = vadd.f32 0.001143296, %v1231_v51  ;;  %v1307_v45 = vadd.f32 0.18741608, %v1306_v44  ;;  %v1187_v11 = vadd.f32 0.18741608, %v1186_v46  ;;  %vm1167_vm0 = vweird.f32 %v3275_v36 }
 0x1eb   : > { %v1355_v61 = vmul.f32 %v1354_v24, %v3243_v40  ;;  %v1094_v54 = vpop.f32.mrf.mxu3  ;;  %v1199_v56 = vmul.f32 %v1198_v26, %v3224_v62  ;;  %v1163_v22 = vsub.f32 1.0, %v1162_v52  ;;  %v3309_v24 = vmul.f32 0.70710677, %v3300_v19  ;;  %vm3352_vm2 = vmor %vm1166_vm1, %vm1167_vm0 }
 0x1ec   : > { %v1233_v1 = vmul.f32 %v1232_v50, %v3264_v57  ;;  %v3282_v49 = vadd.f32 %v1094_v54, %v3188_v23  ;;  %v1342_v23 = vmul.f32 %v1341_v3, %v3243_v40  ;;  %v1172_v26 = vand.u32 2147483648, %v3261_v47 }
 0x1ed   : > { %v1356_v39 = vadd.f32 0.112945676, %v1355_v61  ;;  %v3291_v6 = vadd.f32 1.0, %v1199_v56  ;;  %v1308_v61 = vmul.f32 %v1307_v45, %v3215_v41  ;;  %v1164_v17 = vmul.f32 %v3275_v36, %v1163_v22 }
 0x1ee   : > { %v1234_v14 = vadd.f32 0.014752088, %v1233_v1  ;;  %v3297_v60 = vmul.f32 0.70710677, %v3282_v49  ;;  %v1343_v21 = vadd.f32 0.0036580483, %v1342_v23  ;;  %v1458_v29 = vmul.f32 %v3309_v24, %v3309_v24 }
 0x1ef   : > { %v1357_v31 = vmul.f32 %v1356_v39, %v3243_v40  ;;  %2349 = vrcp.f32 %v3291_v6  ;;  %v3311_v12 = vpop.eup %2347  ;;  %v1188_v48 = vmul.f32 %v1187_v11, %v3224_v62  ;;  %v3326_v41 = vmul.f32 %v1149_v0, %v3194_v8 }
 0x1f0   : > { %v1235_v59 = vmul.f32 %v1234_v14, %v3264_v57  ;;  %v1258_v20 = vmul.f32 %v3297_v60, %v3297_v60  ;;  %v1344_v39 = vmul.f32 %v1343_v21, %v3243_v40  ;;  %v1322_v54 = vmul.f32 %v3311_v12, %v3278_v32 }
 0x1f1   : > { %v1358_v9 = vadd.f32 0.4994258, %v1357_v31  ;;  %v3330_v31 = vmin.f32 %v1458_v29, 16.0  ;;  %v1309_v56 = vadd.f32 1.1283791, %v1308_v61  ;;  %v1165_v8 = vadd.f32 %v3275_v36, %v1164_v17 }
 0x1f2   : > { %v1236_v51 = vadd.f32 0.112945676, %v1235_v59  ;;  %v3318_v27 = vmin.f32 %v1258_v20, 16.0  ;;  %v1332_v1 = vand.u32 2147483648, %v3278_v32  ;;  %v1189_v63 = vadd.f32 1.1283791, %v1188_v48 }
 0x1f3   : > { %v1359_v2 = vmul.f32 %v1358_v9, %v3243_v40  ;;  %v1173_v9 = vor.u32 1.1754944e-38, %v1172_v26  ;;  %v1345_v52 = vadd.f32 0.05243302, %v1344_v39  ;;  %v1323_v46 = vsub.f32 1.0, %v1322_v54 }
 0x1f4   : > { %v1237_v62 = vmul.f32 %v1236_v51, %v3264_v57  ;;  %v1271_v3 = vmul.f32 3.8918573e-05, %v3318_v27  ;;  %v1471_v23 = vmul.f32 3.8918573e-05, %v3330_v31  ;;  %v3357_v59 = vmul.f32 %v1309_v56, %v3207_v25 }
 0x1f5   : > { %v3302_v30 = vadd.f32 1.0, %v1359_v2  ;;  %v3332_v50 = vpop.eup %2349  ;;  %v1221_v2 = vadd.f32 0.00028619796, %v1220_v34  ;;  %v1260_v22 = vmul.f32 2.1237322e-06, %v3318_v27  ;;  %v1169_v21 = vsel %vm3352_vm2, %v3275_v36, %v1165_v8 }
 0x1f6   : > { %v1202_v14 = vmul.f32 %v3332_v50, %v3291_v6  ;;  %v1238_v47 = vadd.f32 0.4994258, %v1237_v62  ;;  %v1272_v11 = vadd.f32 0.001143296, %v1271_v3  ;;  %vm1326_vm3 = vweird.f32 %v3278_v32 }
 0x1f7   : > { %2351 = vrcp.f32 %v3302_v30  ;;  %v1330_v0 = vand.u32 2147483647, %v3278_v32  ;;  %v3368_v58 = vmul.f32 %v1189_v63, %v3218_v10  ;;  %v1333_v25 = vor.u32 1.1754944e-38, %v1332_v1 }
 0x1f8   : > { %v1346_v61 = vmul.f32 %v1345_v52, %v3243_v40  ;;  %v1222_v51 = vmul.f32 %v1221_v2, %v3264_v57  ;;  %v1203_v17 = vsub.f32 1.0, %v1202_v14  ;;  %v1324_v26 = vmul.f32 %v3311_v12, %v1323_v46 }
 0x1f9   : > { %v1472_v29 = vadd.f32 0.001143296, %v1471_v23  ;;  %v3374_v36 = vmul.f32 0.70710677, %v3350_v4  ;;  %v1174_v48 = vsel %vm3334_vm15, %v1173_v9, %v1169_v21  ;;  %v1239_v39 = vmul.f32 %v1238_v47, %v3264_v57 }
 0x1fa   : > { %v1261_v34 = vadd.f32 0.00028619796, %v1260_v22  ;;  %v1273_v10 = vmul.f32 %v1272_v11, %v3318_v27  ;;  %vm3380_vm4 = vcmp.eq.f32.partialorder %v1330_v0, 8.507059e+37  ;;  %vm1206_vm5 = vweird.f32 %v3291_v6 }
 0x1fb   : > { %v1473_v62 = vmul.f32 %v1472_v29, %v3330_v31  ;;  %v1498_v3 = vmul.f32 %v3374_v36, %v3374_v36  ;;  %v1210_v35 = vand.u32 2147483647, %v3291_v6  ;;  %vm1327_vm6 = vweird.f32 %v3311_v12  ;;  %v1068_v29 = vpop.f32.mrf.mxu2 }
 0x1fc   : > { %v1347_v7 = vadd.f32 0.18741608, %v1346_v61  ;;  %v1223_v8 = vadd.f32 0.0036580483, %v1222_v51  ;;  %v2507_v9 = vmov 2   ;;  %v1204_v1 = vmul.f32 %v3332_v50, %v1203_v17  ;;  %vm3416_vm9 = vmor %vm1326_vm3, %vm1327_vm6 }
 0x1fd   : > { %v3343_v44 = vpop.eup %2351  ;;  %2316 = vset.pattern.permute.xlu1 %v2507_v9  ;;  %2318 = vset.pattern.permute.xlu0 %v2507_v9  ;;  %v1325_v63 = vadd.f32 %v3311_v12, %v1324_v26  ;;  %v1474_v52 = vadd.f32 0.014752088, %v1473_v62  ;;  %v3392_v2 = vmin.f32 %v1498_v3, 16.0  ;;  %v1212_v14 = vand.u32 2147483648, %v3291_v6  ;;  %v3492_v62 = vpop.permute.xlu1 %974 }
 0x1fe   : > { %v1362_v20 = vmul.f32 %v3343_v44, %v3302_v30  ;;  %2022 = vperm.xlu1 %2316, %v3146_v38   ;;  %2030 = vperm.xlu0 %2318, %v3175_v37   ;;  %v3397_v46 = vadd.f32 1.0, %v1239_v39  ;;  %v1274_v23 = vadd.f32 0.014752088, %v1273_v10  ;;  %v1460_v45 = vmul.f32 2.1237322e-06, %v3330_v31 }
 0x1ff   : > { %2317 = vset.pattern.permute.xlu2 %v2507_v9  ;;  %v3401_v47 = vmul.f32 %v1174_v48, %v3326_v41  ;;  %v1262_v11 = vmul.f32 %v1261_v34, %v3318_v27  ;;  %v1475_v21 = vmul.f32 %v1474_v52, %v3330_v31  ;;  %vm1207_vm7 = vweird.f32 %v3332_v50 }
 0x200   : > { %v1363_v56 = vsub.f32 1.0, %v1362_v20  ;;  %2026 = vperm.xlu2 %2317, %v3160_v42   ;;  %vm3408_vm8 = vcmp.eq.f32.partialorder %v1210_v35, 8.507059e+37  ;;  %v1224_v41 = vmul.f32 %v1223_v8, %v3264_v57  ;;  %v1511_v0 = vmul.f32 3.8918573e-05, %v3392_v2  ;;  %vm3440_vm11 = vmor %vm1206_vm5, %vm1207_vm7 }
 0x201   : > { %v1205_v42 = vadd.f32 %v3332_v50, %v1204_v1  ;;  %v1329_v20 = vsel %vm3416_vm9, %v3311_v12, %v1325_v63  ;;  %v1348_v61 = vmul.f32 %v1347_v7, %v3243_v40  ;;  %v1476_v51 = vadd.f32 0.112945676, %v1475_v21 }
 0x202   : > { %v1364_v22 = vmul.f32 %v3343_v44, %v1363_v56  ;;  %2353 = vrcp.f32 %v3397_v46  ;;  %v1275_v32 = vmul.f32 %v1274_v23, %v3318_v27  ;;  %v1461_v17 = vadd.f32 0.00028619796, %v1460_v45 }
 0x203   : > { %v1512_v26 = vadd.f32 0.001143296, %v1511_v0  ;;  %vm1367_vm10 = vweird.f32 %v3343_v44  ;;  %v1263_v39 = vadd.f32 0.0036580483, %v1262_v11  ;;  %v1477_v34 = vmul.f32 %v1476_v51, %v3330_v31 }
 0x204   : > { %v1365_v48 = vadd.f32 %v3343_v44, %v1364_v22  ;;  %v1334_v12 = vsel %vm3380_vm4, %v1333_v25, %v1329_v20  ;;  %v1372_v40 = vand.u32 2147483648, %v3302_v30  ;;  %v1225_v10 = vadd.f32 0.05243302, %v1224_v41 }
 0x205   : > { %v1513_v56 = vmul.f32 %v1512_v26, %v3392_v2  ;;  %vm1366_vm12 = vweird.f32 %v3302_v30  ;;  %v1370_v3 = vand.u32 2147483647, %v3302_v30  ;;  %v1478_v35 = vadd.f32 0.4994258, %v1477_v34 }
 0x206   : > { %v3447_v25 = vadd.f32 %v1068_v29, %v3198_v16  ;;  %2034 = vperm.xlu1 %2316, %v3151_v15   ;;  %v1209_v54 = vsel %vm3440_vm11, %v3332_v50, %v1205_v42  ;;  %vm3453_vm13 = vmor %vm1366_vm12, %vm1367_vm10  ;;  %v1276_v7 = vadd.f32 0.112945676, %v1275_v32  ;;  %v1462_v8 = vmul.f32 %v1461_v17, %v3330_v31 }
 0x207   : > { %v1514_v9 = vadd.f32 0.014752088, %v1513_v56  ;;  %v1213_v1 = vor.u32 1.1754944e-38, %v1212_v14  ;;  %v1349_v30 = vadd.f32 1.1283791, %v1348_v61  ;;  %v1369_v63 = vsel %vm3453_vm13, %v3343_v44, %v1365_v48 }
 0x208   : > { %v1264_v15 = vmul.f32 %v1263_v39, %v3318_v27  ;;  %v3462_v52 = vpop.eup %2353  ;;  %v1335_v50 = vmul.f32 %v1334_v12, %v3357_v59  ;;  %v1373_v23 = vor.u32 1.1754944e-38, %v1372_v40  ;;  %v1226_v45 = vmul.f32 %v1225_v10, %v3264_v57 }
 0x209   : > { %v1479_v22 = vmul.f32 %v1478_v35, %v3330_v31  ;;  %v1214_v11 = vsel %vm3408_vm8, %v1213_v1, %v1209_v54  ;;  %vm1371_vm14 = vcmp.eq.f32.partialorder %v1370_v3, 8.507059e+37  ;;  %v1515_v14 = vmul.f32 %v1514_v9, %v3392_v2 }
 0x20a   : > { %v3471_v21 = vmul.f32 0.70710677, %v3447_v25  ;;  %v1374_v44 = vsel %vm1371_vm14, %v1373_v23, %v1369_v63  ;;  %v1277_v37 = vmul.f32 %v1276_v7, %v3318_v27  ;;  %v1463_v41 = vadd.f32 0.0036580483, %v1462_v8  ;;  %v1097_v63 = vpop.f32.mrf.mxu3 }
 0x20b   : > { %v1500_v59 = vmul.f32 2.1237322e-06, %v3392_v2  ;;  %v1242_v0 = vmul.f32 %v3462_v52, %v3397_v46  ;;  %v1265_v42 = vadd.f32 0.05243302, %v1264_v15  ;;  %v3477_v20 = vadd.f32 1.0, %v1479_v22 }
 0x20c   : > { %v1516_v38 = vadd.f32 0.112945676, %v1515_v14  ;;  %v2213_v61 = vclamps-f32 %v3401_v47, 1.0  ;;  %v2217_v51 = vclamps-f32 %v1335_v50, 1.0  ;;  %v1350_v32 = vmul.f32 %v1349_v30, %v3233_v13 }
 0x20d   : > { %v1378_v17 = vmul.f32 %v3471_v21, %v3471_v21  ;;  %v1106_v26 = vmul.f32 0.5, %v3191_v5  ;;  %v1215_v29 = vmul.f32 %v1214_v11, %v3368_v58  ;;  %v1227_v48 = vadd.f32 0.18741608, %v1226_v45  ;;  %v1016_v5 = vpop.f32.mrf.mxu0 }
 0x20e   : > { %v1517_v39 = vmul.f32 %v1516_v38, %v3392_v2  ;;  %v3487_v34 = vmul.f32 0.5, %v3213_v33  ;;  %v1375_v12 = vmul.f32 %v1374_v44, %v1350_v32  ;;  %v1278_v40 = vadd.f32 0.4994258, %v1277_v37 }
 0x20f   : > { %v1501_v10 = vadd.f32 0.00028619796, %v1500_v59  ;;  %v1243_v47 = vsub.f32 1.0, %v1242_v0  ;;  %v1266_v56 = vmul.f32 %v1265_v42, %v3318_v27  ;;  %v1464_v13 = vmul.f32 %v1463_v41, %v3330_v31 }
 0x210   : > { %2355 = vrcp.f32 %v3477_v20  ;;  %v1778_v58 = vadd.f32 1.0, %v2213_v61  ;;  %v1110_v3 = vmul.f32 0.5, %v3204_v55  ;;  %v1782_v35 = vadd.f32 1.0, %v2217_v51 }
 0x211   : > { %v3495_v54 = vmin.f32 %v1378_v17, 16.0  ;;  %v2214_v33 = vclamps-f32 %v1215_v29, 1.0  ;;  %v1111_v6 = vmul.f32 0.5, %v3229_v18  ;;  %v1228_v7 = vmul.f32 %v1227_v48, %v3264_v57 }
 0x212   : > { %v1518_v8 = vadd.f32 0.4994258, %v1517_v39  ;;  %v3500_v9 = vmul.f32 0.5, %v3246_v43  ;;  %v1279_v1 = vmul.f32 %v1278_v40, %v3318_v27  ;;  %v1502_v30 = vmul.f32 %v1501_v10, %v3392_v2 }
 0x213   : > { %v3505_v15 = vadd.f32 %v1016_v5, %v3492_v62  ;;  %v2218_v55 = vclamps-f32 %v1375_v12, 1.0  ;;  %v1244_v50 = vmul.f32 %v3462_v52, %v1243_v47  ;;  %v1267_v23 = vadd.f32 0.18741608, %v1266_v56 }
 0x214   : > { %v1465_v45 = vadd.f32 0.05243302, %v1464_v13  ;;  %v3508_v18 = vmul.f32 %v1778_v58, %v1106_v26  ;;  %v3510_v57 = vmul.f32 %v1782_v35, %v1110_v3  ;;  %v3513_v43 = vmul.f32 0.5, %v3300_v19 }
 0x215   : > { %v1391_v22 = vmul.f32 3.8918573e-05, %v3495_v54  ;;  %v1779_v14 = vadd.f32 1.0, %v2214_v33  ;;  %v1229_v44 = vadd.f32 1.1283791, %v1228_v7  ;;  %v1519_v37 = vmul.f32 %v1518_v8, %v3392_v2 }
 0x216   : > { %v3516_v11 = vpop.eup %2355  ;;  %v3520_v41 = vadd.f32 %v1097_v63, %v3198_v16  ;;  %vm1247_vm15 = vweird.f32 %v3462_v52  ;;  %v3523_v59 = vadd.f32 1.0, %v1279_v1  ;;  %v1503_v0 = vadd.f32 0.0036580483, %v1502_v30 }
 0x217   : > { %v3526_v42 = vmul.f32 0.70710677, %v3505_v15  ;;  %v1783_v19 = vadd.f32 1.0, %v2218_v55  ;;  %v1245_v38 = vadd.f32 %v3462_v52, %v1244_v50  ;;  %v1268_v61 = vmul.f32 %v1267_v23, %v3318_v27 }
 0x218   : > { %v1466_v51 = vmul.f32 %v1465_v45, %v3330_v31  ;;  %v1252_v32 = vand.u32 2147483648, %v3397_v46  ;;  %v1482_v16 = vmul.f32 %v3516_v11, %v3477_v20  ;;  %v1380_v17 = vmul.f32 2.1237322e-06, %v3495_v54 }
 0x219   : > { %v1392_v26 = vadd.f32 0.001143296, %v1391_v22  ;;  %vm1246_vm0 = vweird.f32 %v3397_v46  ;;  %v1250_v29 = vand.u32 2147483647, %v3397_v46  ;;  %v3537_v48 = vadd.f32 1.0, %v1519_v37 }
 0x21a   : > { %v3540_v39 = vmul.f32 0.70710677, %v3520_v41  ;;  %v3544_v27 = vadd.f32 %v3510_v57, %v3508_v18  ;;  %vm3548_vm1 = vmor %vm1246_vm0, %vm1247_vm15  ;;  %2357 = vrcp.f32 %v3523_v59  ;;  %v1504_v40 = vmul.f32 %v1503_v0, %v3392_v2 }
 0x21b   : > { %v1618_v46 = vmul.f32 %v3526_v42, %v3526_v42  ;;  %v3556_v10 = vmul.f32 %v1783_v19, %v1111_v6  ;;  %v1249_v47 = vsel %vm3548_vm1, %v3462_v52, %v1245_v38  ;;  %v1269_v56 = vadd.f32 1.1283791, %v1268_v61 }
 0x21c   : > { %v1467_v13 = vadd.f32 0.18741608, %v1466_v51  ;;  %v1253_v5 = vor.u32 1.1754944e-38, %v1252_v32  ;;  %v1483_v58 = vsub.f32 1.0, %v1482_v16  ;;  %v1381_v3 = vadd.f32 0.00028619796, %v1380_v17 }
 0x21d   : > { %v1393_v35 = vmul.f32 %v1392_v26, %v3495_v54  ;;  %v3563_v33 = vmul.f32 %v1779_v14, %v3487_v34  ;;  %vm1251_vm2 = vcmp.eq.f32.partialorder %v1250_v29, 8.507059e+37  ;;  %2359 = vrcp.f32 %v3537_v48  ;;  %v1045_v14 = vpop.f32.mrf.mxu1 }
 0x21e   : > { %v1418_v6 = vmul.f32 %v3540_v39, %v3540_v39  ;;  %v1230_v7 = vmul.f32 %v1229_v44, %v3253_v53  ;;  %v1254_v8 = vsel %vm1251_vm2, %v1253_v5, %v1249_v47  ;;  %v1505_v52 = vadd.f32 0.05243302, %v1504_v40 }
 0x21f   : > { %v3569_v1 = vmin.f32 %v1618_v46, 16.0  ;;  %v3573_v30 = vadd.f32 %v3556_v10, %v3563_v33  ;;  %v3576_v63 = vmul.f32 %v1269_v56, %v3297_v60  ;;  %v1468_v34 = vmul.f32 %v1467_v13, %v3330_v31 }
 0x220   : > { %v3580_v55 = vmul.f32 0.5, %v3350_v4  ;;  %v3582_v50 = vpop.eup %2357  ;;  %v1484_v53 = vmul.f32 %v3516_v11, %v1483_v58  ;;  %v1382_v23 = vmul.f32 %v1381_v3, %v3495_v54  ;;  %v1394_v45 = vadd.f32 0.014752088, %v1393_v35 }
 0x221   : > { %v1620_v22 = vmul.f32 2.1237322e-06, %v3569_v1  ;;  %v1255_v44 = vmul.f32 %v1254_v8, %v1230_v7  ;;  %v1292_v37 = vand.u32 2147483648, %v3523_v59  ;;  %v3588_v60 = vmin.f32 %v1418_v6, 16.0 }
 0x222   : > { %v1631_v31 = vmul.f32 3.8918573e-05, %v3569_v1  ;;  %v1290_v4 = vand.u32 2147483647, %v3523_v59  ;;  %v1492_v0 = vand.u32 2147483648, %v3477_v20  ;;  %v1506_v19 = vmul.f32 %v1505_v52, %v3392_v2 }
 0x223   : > { %v3595_v38 = vmul.f32 0.5, %v3447_v25  ;;  %v3597_v61 = vpop.eup %2359  ;;  %v1282_v51 = vmul.f32 %v3582_v50, %v3523_v59  ;;  %v1621_v32 = vadd.f32 0.00028619796, %v1620_v22  ;;  %v3602_v17 = vadd.f32 %v1045_v14, %v3492_v62 }
 0x224   : > { %v1632_v16 = vadd.f32 0.001143296, %v1631_v31  ;;  %v1485_v26 = vadd.f32 %v3516_v11, %v1484_v53  ;;  %vm1487_vm3 = vweird.f32 %v3516_v11  ;;  %v1383_v29 = vadd.f32 0.0036580483, %v1382_v23  ;;  %v1071_v53 = vpop.f32.mrf.mxu2 }
 0x225   : > { %v1395_v12 = vmul.f32 %v1394_v45, %v3495_v54  ;;  %v2215_v40 = vclamps-f32 %v1255_v44, 1.0  ;;  %v3607_v25 = vor.u32 1.1754944e-38, %v1292_v37  ;;  %v1469_v46 = vadd.f32 1.1283791, %v1468_v34 }
 0x226   : > { %v1431_v47 = vmul.f32 3.8918573e-05, %v3588_v60  ;;  %vm1486_vm4 = vweird.f32 %v3477_v20  ;;  %v1490_v56 = vand.u32 2147483647, %v3477_v20  ;;  %v1507_v13 = vadd.f32 0.18741608, %v1506_v19 }
 0x227   : > { %v1522_v5 = vmul.f32 %v3597_v61, %v3537_v48  ;;  %v1283_v58 = vsub.f32 1.0, %v1282_v51  ;;  %vm3614_vm5 = vmor %vm1486_vm4, %vm1487_vm3  ;;  %v1493_v35 = vor.u32 1.1754944e-38, %v1492_v0  ;;  %v1622_v6 = vmul.f32 %v1621_v32, %v3569_v1 }
 0x228   : > { %v1633_v7 = vmul.f32 %v1632_v16, %v3569_v1  ;;  %v1489_v8 = vsel %vm3614_vm5, %v3516_v11, %v1485_v26  ;;  %v1384_v20 = vmul.f32 %v1383_v29, %v3495_v54  ;;  %v1396_v52 = vadd.f32 0.112945676, %v1395_v12 }
 0x229   : > { %v3625_v34 = vmul.f32 0.70710677, %v3602_v17  ;;  %v1470_v23 = vmul.f32 %v1469_v46, %v3309_v24  ;;  %v1420_v45 = vmul.f32 2.1237322e-06, %v3588_v60  ;;  %v1432_v22 = vadd.f32 0.001143296, %v1431_v47 }
 0x22a   : > { %v1634_v14 = vadd.f32 0.014752088, %v1633_v7  ;;  %vm1491_vm6 = vcmp.eq.f32.partialorder %v1490_v56, 8.507059e+37  ;;  %v1508_v44 = vmul.f32 %v1507_v13, %v3392_v2  ;;  %v1523_v37 = vsub.f32 1.0, %v1522_v5 }
 0x22b   : > { %v1658_v11 = vmul.f32 %v3625_v34, %v3625_v34  ;;  %v1494_v31 = vsel %vm1491_vm6, %v1493_v35, %v1489_v8  ;;  %v1623_v0 = vadd.f32 0.0036580483, %v1622_v6  ;;  %v3634_v51 = vadd.f32 %v1071_v53, %v3288_v28 }
 0x22c   : > { %v1635_v19 = vmul.f32 %v1634_v14, %v3569_v1  ;;  %v1780_v32 = vadd.f32 1.0, %v2215_v40  ;;  %v1385_v24 = vadd.f32 0.05243302, %v1384_v20  ;;  %v1397_v16 = vmul.f32 %v1396_v52, %v3495_v54 }
 0x22d   : > { %v3637_v26 = vmin.f32 %v1658_v11, 16.0  ;;  %v1284_v29 = vmul.f32 %v3582_v50, %v1283_v58  ;;  %v1421_v2 = vadd.f32 0.00028619796, %v1420_v45  ;;  %v1433_v12 = vmul.f32 %v1432_v22, %v3588_v60 }
 0x22e   : > { %v1636_v46 = vadd.f32 0.112945676, %v1635_v19  ;;  %v1495_v47 = vmul.f32 %v1494_v31, %v1470_v23  ;;  %v1524_v56 = vmul.f32 %v3597_v61, %v1523_v37  ;;  %vm1287_vm7 = vweird.f32 %v3582_v50 }
 0x22f   : > { %v1660_v13 = vmul.f32 2.1237322e-06, %v3637_v26  ;;  %v1671_v5 = vmul.f32 3.8918573e-05, %v3637_v26  ;;  %v1509_v40 = vadd.f32 1.1283791, %v1508_v44  ;;  %vm1526_vm8 = vweird.f32 %v3537_v48 }
 0x230   : > { %v1624_v3 = vmul.f32 %v1623_v0, %v3569_v1  ;;  %v3648_v58 = vmul.f32 0.70710677, %v3634_v51  ;;  %v1532_v35 = vand.u32 2147483648, %v3537_v48  ;;  %v1386_v6 = vmul.f32 %v1385_v24, %v3495_v54 }
 0x231   : > { %v1398_v7 = vadd.f32 0.4994258, %v1397_v16  ;;  %v1637_v8 = vmul.f32 %v1636_v46, %v3569_v1  ;;  %vm1286_vm9 = vweird.f32 %v3523_v59  ;;  %vm1527_vm10 = vweird.f32 %v3597_v61 }
 0x232   : > { %v1434_v20 = vadd.f32 0.014752088, %v1433_v12  ;;  %v1661_v52 = vadd.f32 0.00028619796, %v1660_v13  ;;  %v1672_v53 = vadd.f32 0.001143296, %v1671_v5  ;;  %v1525_v45 = vadd.f32 %v3597_v61, %v1524_v56  ;;  %vm3675_vm12 = vmor %vm1526_vm8, %vm1527_vm10 }
 0x233   : > { %v2221_v23 = vclamps-f32 %v1495_v47, 1.0  ;;  %v1422_v22 = vmul.f32 %v1421_v2, %v3588_v60  ;;  %v1638_v14 = vadd.f32 0.4994258, %v1637_v8  ;;  %v1625_v44 = vadd.f32 0.05243302, %v1624_v3  ;;  %vm3701_vm14 = vmor %vm1286_vm9, %vm1287_vm7 }
 0x234   : > { %v1662_v37 = vmul.f32 %v1661_v52, %v3637_v26  ;;  %v1673_v11 = vmul.f32 %v1672_v53, %v3637_v26  ;;  %v1538_v31 = vmul.f32 %v3648_v58, %v3648_v58  ;;  %v1530_v0 = vand.u32 2147483647, %v3537_v48  ;;  %v1100_v52 = vpop.f32.mrf.mxu3 }
 0x235   : > { %v1387_v19 = vadd.f32 0.18741608, %v1386_v6  ;;  %v1399_v24 = vmul.f32 %v1398_v7, %v3495_v54  ;;  %v1639_v16 = vmul.f32 %v1638_v14, %v3569_v1  ;;  %v1285_v12 = vadd.f32 %v3582_v50, %v1284_v29 }
 0x236   : > { %vm3667_vm11 = vcmp.eq.f32.partialorder %v1290_v4, 8.507059e+37  ;;  %v1435_v47 = vmul.f32 %v1434_v20, %v3588_v60  ;;  %v1674_v56 = vadd.f32 0.014752088, %v1673_v11  ;;  %v3680_v13 = vmin.f32 %v1538_v31, 16.0 }
 0x237   : > { %v1529_v4 = vsel %vm3675_vm12, %v3597_v61, %v1525_v45  ;;  %v1533_v29 = vor.u32 1.1754944e-38, %v1532_v35  ;;  %v1423_v5 = vadd.f32 0.0036580483, %v1422_v22  ;;  %v1663_v3 = vadd.f32 0.0036580483, %v1662_v37  ;;  %v1074_v45 = vpop.f32.mrf.mxu2 }
 0x238   : > { %v1786_v6 = vadd.f32 1.0, %v2221_v23  ;;  %v1626_v7 = vmul.f32 %v1625_v44, %v3569_v1  ;;  %v3686_v48 = vadd.f32 1.0, %v1639_v16  ;;  %v1675_v8 = vmul.f32 %v1674_v56, %v3637_v26 }
 0x239   : > { %v3690_v20 = vmul.f32 %v1780_v32, %v3500_v9  ;;  %vm1531_vm13 = vcmp.eq.f32.partialorder %v1530_v0, 8.507059e+37  ;;  %v1388_v53 = vmul.f32 %v1387_v19, %v3495_v54  ;;  %v3693_v14 = vadd.f32 1.0, %v1399_v24 }
 0x23a   : > { %v1534_v61 = vsel %vm1531_vm13, %v1533_v29, %v1529_v4  ;;  %v1436_v35 = vadd.f32 0.112945676, %v1435_v47  ;;  %2361 = vrcp.f32 %v3686_v48  ;;  %v1551_v23 = vmul.f32 3.8918573e-05, %v3680_v13 }
 0x23b   : > { %v1510_v9 = vmul.f32 %v1509_v40, %v3374_v36  ;;  %v1424_v54 = vmul.f32 %v1423_v5, %v3588_v60  ;;  %v1664_v32 = vmul.f32 %v1663_v3, %v3637_v26  ;;  %v3709_v22 = vadd.f32 %v1100_v52, %v3288_v28 }
 0x23c   : > { %v1289_v44 = vsel %vm3701_vm14, %v3582_v50, %v1285_v12  ;;  %v3715_v37 = vmul.f32 %v1786_v6, %v3513_v43  ;;  %v1627_v59 = vadd.f32 0.18741608, %v1626_v7  ;;  %v1676_v11 = vadd.f32 0.112945676, %v1675_v8 }
 0x23d   : > { %v1535_v31 = vmul.f32 %v1534_v61, %v1510_v9  ;;  %2363 = vrcp.f32 %v3693_v14  ;;  %v3719_v36 = vmul.f32 0.5, %v3505_v15  ;;  %v3722_v40 = vmul.f32 0.5, %v3602_v17 }
 0x23e   : > { %v3724_v28 = vadd.f32 1.1283791, %v1388_v53  ;;  %v1437_v0 = vmul.f32 %v1436_v35, %v3588_v60  ;;  %v1677_v50 = vmul.f32 %v1676_v11, %v3637_v26  ;;  %v1552_v19 = vadd.f32 0.001143296, %v1551_v23 }
 0x23f   : > { %v3731_v43 = vsel %vm3667_vm11, %v3607_v25, %v1289_v44  ;;  %v1425_v24 = vadd.f32 0.05243302, %v1424_v54  ;;  %v1665_v16 = vadd.f32 0.05243302, %v1664_v32  ;;  %v3734_v15 = vmul.f32 0.70710677, %v3709_v22 }
 0x240   : > { %v2362_v12 = vpop.eup %2361  ;;  %v3738_v17 = vadd.f32 %v3544_v27, %v3715_v37  ;;  %v1628_v46 = vmul.f32 %v1627_v59, %v3569_v1  ;;  %v1678_v47 = vadd.f32 0.4994258, %v1677_v50  ;;  %v2222_v56 = vclamps-f32 %v1535_v31, 1.0 }
 0x241   : > { %v1410_v4 = vand.u32 2147483647, %v3693_v14  ;;  %v1412_v2 = vand.u32 2147483648, %v3693_v14  ;;  %v1642_v25 = vmul.f32 %v2362_v12, %v3686_v48  ;;  %v1438_v29 = vadd.f32 0.4994258, %v1437_v0 }
 0x242   : > { %v1679_v5 = vmul.f32 %v1678_v47, %v3637_v26  ;;  %v1540_v3 = vmul.f32 2.1237322e-06, %v3680_v13  ;;  %v1553_v6 = vmul.f32 %v1552_v19, %v3680_v13  ;;  %v2508_v8 = vmov 32.0  }
 0x243   : > { %v3747_v7 = vpop.eup %2363  ;;  %v1643_v27 = vsub.f32 1.0, %v1642_v25  ;;  %2365 = vrcp.f32 %v2508_v8  ;;  %v1666_v1 = vmul.f32 %v1665_v16, %v3637_v26  ;;  %v1578_v52 = vmul.f32 %v3734_v15, %v3734_v15 }
 0x244   : > { %v1629_v53 = vadd.f32 1.1283791, %v1628_v46  ;;  %v1650_v61 = vand.u32 2147483647, %v3686_v48  ;;  %v1652_v35 = vand.u32 2147483648, %v3686_v48  ;;  %v3754_v23 = vadd.f32 1.0, %v1679_v5 }
 0x245   : > { %v1644_v9 = vmul.f32 %v2362_v12, %v1643_v27  ;;  %vm1647_vm15 = vweird.f32 %v2362_v12  ;;  %v1554_v54 = vadd.f32 0.014752088, %v1553_v6  ;;  %v3756_v32 = vmin.f32 %v1578_v52, 16.0 }
 0x246   : > { %v1402_v44 = vmul.f32 %v3747_v7, %v3693_v14  ;;  %v3761_v59 = vmul.f32 %v1425_v24, %v3588_v60  ;;  %2367 = vrcp.f32 %v3754_v23  ;;  %v1541_v11 = vadd.f32 0.00028619796, %v1540_v3 }
 0x247   : > { %v1645_v31 = vadd.f32 %v2362_v12, %v1644_v9  ;;  %vm1646_vm0 = vweird.f32 %v3686_v48  ;;  %v1667_v0 = vadd.f32 0.18741608, %v1666_v1  ;;  %v3766_v50 = vadd.f32 %v1074_v45, %v3492_v62 }
 0x248   : > { %v1787_v19 = vadd.f32 1.0, %v2222_v56  ;;  %vm1648_vm1 = vmor %vm1646_vm0, %vm1647_vm15  ;;  %v1653_v16 = vor.u32 1.1754944e-38, %v1652_v35  ;;  %v1555_v46 = vmul.f32 %v1554_v54, %v3680_v13  ;;  %v1591_v47 = vmul.f32 3.8918573e-05, %v3756_v32 }
 0x249   : > { %v3770_v25 = vpop.eup %2365  ;;  %v1439_v24 = vmul.f32 %v1438_v29, %v3588_v60  ;;  %v1630_v5 = vmul.f32 %v1629_v53, %v3526_v42  ;;  %v1649_v3 = vsel %vm1648_vm1, %v2362_v12, %v1645_v31  ;;  %vm1651_vm2 = vcmp.eq.f32.partialorder %v1650_v61, 8.507059e+37 }
 0x24a   : > { %v1654_v48 = vsel %vm1651_vm2, %v1653_v16, %v1649_v3  ;;  %v1542_v6 = vmul.f32 %v1541_v11, %v3680_v13  ;;  %v1556_v27 = vadd.f32 0.112945676, %v1555_v46  ;;  %v1592_v8 = vadd.f32 0.001143296, %v1591_v47 }
 0x24b   : > { %v1403_v56 = vsub.f32 1.0, %v1402_v44  ;;  %v1655_v1 = vmul.f32 %v1654_v48, %v1630_v5  ;;  %v1668_v52 = vmul.f32 %v1667_v0, %v3637_v26  ;;  %v3777_v35 = vmul.f32 0.70710677, %v3766_v50 }
 0x24c   : > { %v2368_v45 = vpop.eup %2367  ;;  %v3780_v9 = vmul.f32 %v1787_v19, %v3580_v55  ;;  %v3782_v29 = vor.u32 1.1754944e-38, %v1412_v2  ;;  %v1557_v42 = vmul.f32 %v1556_v27, %v3680_v13  ;;  %v1593_v12 = vmul.f32 %v1592_v8, %v3756_v32  ;;  %v1103_v27 = vpop.f32.mrf.mxu3 }
 0x24d   : > { %v3786_v53 = vadd.f32 1.0, %v1439_v24  ;;  %v2225_v61 = vclamps-f32 %v1655_v1, 1.0  ;;  %v1847_v54 = vmul.f32 32.0, %v3770_v25  ;;  %v1682_v26 = vmul.f32 %v2368_v45, %v3754_v23 }
 0x24e   : > { %v1543_v44 = vadd.f32 0.0036580483, %v1542_v6  ;;  %v1558_v11 = vadd.f32 0.4994258, %v1557_v42  ;;  %v1594_v31 = vadd.f32 0.014752088, %v1593_v12  ;;  %v1698_v55 = vmul.f32 %v3777_v35, %v3777_v35 }
 0x24f   : > { %v1404_v2 = vmul.f32 %v3747_v7, %v1403_v56  ;;  %v1790_v0 = vadd.f32 1.0, %v2225_v61  ;;  %v1669_v19 = vadd.f32 1.1283791, %v1668_v52  ;;  %v1683_v16 = vsub.f32 1.0, %v1682_v26 }
 0x250   : > { %v1692_v46 = vand.u32 2147483648, %v3754_v23  ;;  %v1559_v47 = vmul.f32 %v1558_v11, %v3680_v13  ;;  %v1595_v24 = vmul.f32 %v1594_v31, %v3756_v32  ;;  %v3796_v5 = vmin.f32 %v1698_v55, 16.0 }
 0x251   : > { %vm1406_vm3 = vweird.f32 %v3693_v14  ;;  %v3800_v3 = vmul.f32 %v1790_v0, %v3719_v36  ;;  %v1684_v48 = vmul.f32 %v2368_v45, %v1683_v16  ;;  %vm1687_vm4 = vweird.f32 %v2368_v45 }
 0x252   : > { %v1690_v6 = vand.u32 2147483647, %v3754_v23  ;;  %v1848_v8 = vsub.f32 1.0, %v1847_v54  ;;  %vm1686_vm5 = vweird.f32 %v3754_v23  ;;  %v1544_v56 = vmul.f32 %v1543_v44, %v3680_v13 }
 0x253   : > { %v3805_v1 = vadd.f32 1.0, %v1559_v47  ;;  %v1812_v52 = vadd.f32 %v3738_v17, %v3800_v3  ;;  %v1685_v42 = vadd.f32 %v2368_v45, %v1684_v48  ;;  %v1596_v12 = vadd.f32 0.112945676, %v1595_v24  ;;  %vm1688_vm6 = vmor %vm1686_vm5, %vm1687_vm4 }
 0x254   : > { %v1700_v36 = vmul.f32 2.1237322e-06, %v3796_v5  ;;  %v1693_v61 = vor.u32 1.1754944e-38, %v1692_v46  ;;  %v1711_v26 = vmul.f32 3.8918573e-05, %v3796_v5  ;;  %v3813_v54 = vadd.f32 %v1103_v27, %v3492_v62 }
 0x255   : > { %2369 = vrcp.f32 %v3805_v1  ;;  %vm3817_vm7 = vcmp.eq.f32.partialorder %v1410_v4, 8.507059e+37  ;;  %v1813_v17 = vrot.slane %v1812_v52, 4  ;;  %v1670_v44 = vmul.f32 %v1669_v19, %v3625_v34 }
 0x256   : > { %v1689_v11 = vsel %vm1688_vm6, %v2368_v45, %v1685_v42  ;;  %vm1691_vm8 = vcmp.eq.f32.partialorder %v1690_v6, 8.507059e+37  ;;  %vm1407_vm9 = vweird.f32 %v3747_v7  ;;  %v1580_v55 = vmul.f32 2.1237322e-06, %v3756_v32 }
 0x257   : > { %v1694_v31 = vsel %vm1691_vm8, %v1693_v61, %v1689_v11  ;;  %v1701_v0 = vadd.f32 0.00028619796, %v1700_v36  ;;  %v1405_v62 = vadd.f32 %v3747_v7, %v1404_v2  ;;  %v1814_v16 = vadd.f32 %v1813_v17, %v1812_v52  ;;  %vm3840_vm10 = vmor %vm1406_vm3, %vm1407_vm9 }
 0x258   : > { %v1695_v46 = vmul.f32 %v1694_v31, %v1670_v44  ;;  %v1597_v4 = vmul.f32 %v1596_v12, %v3756_v32  ;;  %v1427_v47 = vadd.f32 0.18741608, %v3761_v59  ;;  %v1849_v24 = vmul.f32 %v3770_v25, %v1848_v8 }
 0x259   : > { %v1712_v48 = vadd.f32 0.001143296, %v1711_v26  ;;  %v3829_v34 = vmul.f32 0.70710677, %v3813_v54  ;;  %2371 = vrcp.f32 %v3786_v53  ;;  %v1815_v45 = vrot.slane %v1814_v16, 2 }
 0x25a   : > { %v2226_v19 = vclamps-f32 %v1695_v46, 1.0  ;;  %v1545_v6 = vadd.f32 0.05243302, %v1544_v56  ;;  %v1820_v2 = vadd.f32 %v3573_v30, %v3780_v9  ;;  %v1581_v8 = vadd.f32 0.00028619796, %v1580_v55 }
 0x25b   : > { %v3832_v27 = vpop.eup %2369  ;;  %v1702_v52 = vmul.f32 %v1701_v0, %v3796_v5  ;;  %v1713_v42 = vmul.f32 %v1712_v48, %v3796_v5  ;;  %v1409_v56 = vsel %vm3840_vm10, %v3747_v7, %v1405_v62  ;;  %v1816_v12 = vadd.f32 %v1815_v45, %v1814_v16 }
 0x25c   : > { %v1791_v36 = vadd.f32 1.0, %v2226_v19  ;;  %v1598_v30 = vadd.f32 0.4994258, %v1597_v4  ;;  %v1850_v61 = vadd.f32 %v3770_v25, %v1849_v24  ;;  %v1562_v14 = vmul.f32 %v3832_v27, %v3805_v1 }
 0x25d   : > { %v1714_v26 = vadd.f32 0.014752088, %v1713_v42  ;;  %v1738_v17 = vmul.f32 %v3829_v34, %v3829_v34  ;;  %v1817_v44 = vrot.slane %v1816_v12, 1  ;;  %vm1851_vm11 = vweird.f32 %v3770_v25 }
 0x25e   : > { %v3856_v11 = vmul.f32 %v1791_v36, %v3722_v40  ;;  %v1546_v7 = vmul.f32 %v1545_v6, %v3680_v13  ;;  %v1390_v31 = vmul.f32 %v3724_v28, %v3471_v21  ;;  %v1414_v55 = vsel %vm3817_vm7, %v3782_v29, %v1409_v56 }
 0x25f   : > { %v1582_v0 = vmul.f32 %v1581_v8, %v3756_v32  ;;  %v1703_v62 = vadd.f32 0.0036580483, %v1702_v52  ;;  %v3865_v16 = vpop.eup %2371  ;;  %v1428_v46 = vmul.f32 %v1427_v47, %v3588_v60  ;;  %v1818_v4 = vadd.f32 %v1817_v44, %v1816_v12 }
 0x260   : > { %v1821_v40 = vadd.f32 %v1820_v2, %v3856_v11  ;;  %v1599_v24 = vmul.f32 %v1598_v30, %v3756_v32  ;;  %v3871_v48 = vsel %vm1851_vm11, %v3770_v25, %v1850_v61  ;;  %v1563_v21 = vsub.f32 1.0, %v1562_v14 }
 0x261   : > { %v1715_v28 = vmul.f32 %v1714_v26, %v3796_v5  ;;  %v3874_v23 = vmin.f32 %v1738_v17, 16.0  ;;  %v1415_v29 = vmul.f32 %v1414_v55, %v1390_v31  ;;  %v3877_v19 = vmul.f32 0.5, %v3634_v51 }
 0x262   : > { %v1822_v45 = vrot.slane %v1821_v40, 4  ;;  %v1547_v6 = vadd.f32 0.18741608, %v1546_v7  ;;  %v1442_v60 = vmul.f32 %v3865_v16, %v3786_v53  ;;  %v1583_v47 = vadd.f32 0.0036580483, %v1582_v0 }
 0x263   : > { %v1704_v2 = vmul.f32 %v1703_v62, %v3796_v5  ;;  %v1716_v59 = vadd.f32 0.112945676, %v1715_v28  ;;  %v3882_v25 = vadd.f32 1.1283791, %v1428_v46  ;;  %v1450_v8 = vand.u32 2147483647, %v3786_v53 }
 0x264   : > { %v1853_v52 = vmul.f32 %v3871_v48, %v1818_v4  ;;  %v3886_v42 = vadd.f32 1.0, %v1599_v24  ;;  %v1823_v56 = vadd.f32 %v1822_v45, %v1821_v40  ;;  %v1564_v51 = vmul.f32 %v3832_v27, %v1563_v21 }
 0x265   : > { %v1717_v12 = vmul.f32 %v1716_v59, %v3796_v5  ;;  %v1751_v36 = vmul.f32 3.8918573e-05, %v3874_v23  ;;  %v2219_v30 = vclamps-f32 %v1415_v29, 1.0  ;;  %v1452_v61 = vand.u32 2147483648, %v3786_v53 }
 0x266   : > { %v1548_v14 = vmul.f32 %v1547_v6, %v3680_v13  ;;  %v1740_v26 = vmul.f32 2.1237322e-06, %v3874_v23  ;;  %v1443_v17 = vsub.f32 1.0, %v1442_v60  ;;  %v1824_v44 = vrot.slane %v1823_v56, 2 }
 0x267   : > { %v1584_v7 = vmul.f32 %v1583_v47, %v3756_v32  ;;  %v1705_v31 = vadd.f32 0.05243302, %v1704_v2  ;;  %v3896_v55 = vsub.f32 %v3508_v18, %v1853_v52  ;;  %v3899_v0 = vsub.f32 %v3510_v57, %v1853_v52 }
 0x268   : > { %vm1567_vm12 = vweird.f32 %v3832_v27  ;;  %v1718_v62 = vadd.f32 0.4994258, %v1717_v12  ;;  %v1825_v46 = vadd.f32 %v1824_v44, %v1823_v56  ;;  %v1565_v4 = vadd.f32 %v3832_v27, %v1564_v51 }
 0x269   : > { %2373 = vrcp.f32 %v3886_v42  ;;  %v1752_v13 = vadd.f32 0.001143296, %v1751_v36  ;;  %v1549_v40 = vadd.f32 1.1283791, %v1548_v14  ;;  %v1572_v24 = vand.u32 2147483648, %v3805_v1 }
 0x26a   : > { %v1719_v21 = vmul.f32 %v1718_v62, %v3796_v5  ;;  %v1741_v28 = vadd.f32 0.00028619796, %v1740_v26  ;;  %v1826_v18 = vrot.slane %v1825_v46, 1  ;;  %vm1566_vm13 = vweird.f32 %v3805_v1 }
 0x26b   : > { %v1570_v57 = vand.u32 2147483647, %v3805_v1  ;;  %v1706_v29 = vmul.f32 %v1705_v31, %v3796_v5  ;;  %v1873_v45 = vmul.f32 %v3896_v55, %v3896_v55  ;;  %v1877_v6 = vmul.f32 %v3899_v0, %v3899_v0  ;;  %vm3915_vm14 = vmor %vm1566_vm13, %vm1567_vm12 }
 0x26c   : > { %v3919_v47 = vadd.f32 1.0, %v1719_v21  ;;  %v1753_v2 = vmul.f32 %v1752_v13, %v3874_v23  ;;  %v1784_v59 = vadd.f32 1.0, %v2219_v30  ;;  %v1827_v1 = vadd.f32 %v1826_v18, %v1825_v46 }
 0x26d   : > { %v1569_v56 = vsel %vm3915_vm14, %v3832_v27, %v1565_v4  ;;  %v1585_v51 = vadd.f32 0.05243302, %v1584_v7  ;;  %v3926_v12 = vsub.f32 %v3715_v37, %v1853_v52  ;;  %v1573_v36 = vor.u32 1.1754944e-38, %v1572_v24 }
 0x26e   : > { %2375 = vrcp.f32 %v3919_v47  ;;  %v1742_v14 = vmul.f32 %v1741_v28, %v3874_v23  ;;  %v1444_v44 = vmul.f32 %v3865_v16, %v1443_v17  ;;  %v1854_v30 = vmul.f32 %v3871_v48, %v1827_v1 }
 0x26f   : > { %v3930_v26 = vpop.eup %2373  ;;  %v1550_v31 = vmul.f32 %v1549_v40, %v3648_v58  ;;  %vm1571_vm15 = vcmp.eq.f32.partialorder %v1570_v57, 8.507059e+37  ;;  %v1889_v62 = vadd.f32 %v1877_v6, %v1873_v45  ;;  %v1707_v7 = vadd.f32 0.18741608, %v1706_v29 }
 0x270   : > { %v1574_v27 = vsel %vm1571_vm15, %v1573_v36, %v1569_v56  ;;  %v1754_v46 = vadd.f32 0.014752088, %v1753_v2  ;;  %v3936_v37 = vsub.f32 %v3563_v33, %v1854_v30  ;;  %v3939_v4 = vsub.f32 %v3556_v10, %v1854_v30 }
 0x271   : > { %v3942_v13 = vsub.f32 %v3780_v9, %v1854_v30  ;;  %v1586_v17 = vmul.f32 %v1585_v51, %v3756_v32  ;;  %v3946_v24 = vsub.f32 %v3800_v3, %v1853_v52  ;;  %v1881_v58 = vmul.f32 %v3926_v12, %v3926_v12 }
 0x272   : > { %v1602_v40 = vmul.f32 %v3930_v26, %v3886_v42  ;;  %v1743_v21 = vadd.f32 0.0036580483, %v1742_v14  ;;  %vm1447_vm0 = vweird.f32 %v3865_v16  ;;  %v3954_v10 = vsub.f32 %v3856_v11, %v1854_v30 }
 0x273   : > { %v1874_v33 = vmul.f32 %v3936_v37, %v3936_v37  ;;  %v1878_v9 = vmul.f32 %v3939_v4, %v3939_v4  ;;  %v1575_v3 = vmul.f32 %v1574_v27, %v1550_v31  ;;  %v3961_v28 = vmul.f32 %v1784_v59, %v3595_v38 }
 0x274   : > { %v2376_v52 = vpop.eup %2375  ;;  %v1890_v18 = vadd.f32 %v1889_v62, %v1881_v58  ;;  %v1708_v57 = vmul.f32 %v1707_v7, %v3796_v5  ;;  %v1755_v29 = vmul.f32 %v1754_v46, %v3874_v23  ;;  %vm1446_vm1 = vweird.f32 %v3786_v53 }
 0x275   : > { %v1882_v11 = vmul.f32 %v3942_v13, %v3942_v13  ;;  %v1898_v45 = vadd.f32 %v1878_v9, %v1874_v33  ;;  %v1587_v6 = vadd.f32 0.18741608, %v1586_v17  ;;  %v1722_v60 = vmul.f32 %v2376_v52, %v3919_v47  ;;  %vm3988_vm7 = vmor %vm1446_vm1, %vm1447_vm0 }
 0x276   : > { %v1885_v2 = vmul.f32 %v3946_v24, %v3946_v24  ;;  %v1603_v1 = vsub.f32 1.0, %v1602_v40  ;;  %v1744_v38 = vmul.f32 %v1743_v21, %v3874_v23  ;;  %v1756_v59 = vadd.f32 0.112945676, %v1755_v29 }
 0x277   : > { %v1886_v5 = vmul.f32 %v3954_v10, %v3954_v10  ;;  %v1899_v56 = vadd.f32 %v1898_v45, %v1882_v11  ;;  %v2223_v51 = vclamps-f32 %v1575_v3, 1.0  ;;  %v1723_v36 = vsub.f32 1.0, %v1722_v60 }
 0x278   : > { %v1891_v14 = vadd.f32 %v1890_v18, %v1885_v2  ;;  %v1709_v30 = vadd.f32 1.1283791, %v1708_v57  ;;  %v1732_v31 = vand.u32 2147483648, %v3919_v47  ;;  %v1757_v62 = vmul.f32 %v1756_v59, %v3874_v23 }
 0x279   : > { %v1900_v27 = vadd.f32 %v1899_v56, %v1886_v5  ;;  %v1724_v7 = vmul.f32 %v2376_v52, %v1723_v36  ;;  %vm1727_vm2 = vweird.f32 %v2376_v52  ;;  %v1730_v46 = vand.u32 2147483647, %v3919_v47 }
 0x27a   : > { %v1445_v17 = vadd.f32 %v3865_v16, %v1444_v44  ;;  %v1604_v58 = vmul.f32 %v3930_v26, %v1603_v1  ;;  %v1745_v40 = vadd.f32 0.05243302, %v1744_v38  ;;  %v1758_v21 = vadd.f32 0.4994258, %v1757_v62 }
 0x27b   : > { %v1588_v33 = vmul.f32 %v1587_v6, %v3756_v32  ;;  %vm1607_vm3 = vweird.f32 %v3930_v26  ;;  %v1725_v9 = vadd.f32 %v2376_v52, %v1724_v7  ;;  %vm1726_vm4 = vweird.f32 %v3919_v47 }
 0x27c   : > { %v1892_v3 = vrot.slane %v1891_v14, 4  ;;  %v1901_v18 = vrot.slane %v1900_v27, 4  ;;  %vm1728_vm5 = vmor %vm1726_vm4, %vm1727_vm2  ;;  %v1733_v57 = vor.u32 1.1754944e-38, %v1732_v31  ;;  %v1759_v29 = vmul.f32 %v1758_v21, %v3874_v23 }
 0x27d   : > { %v1788_v11 = vadd.f32 1.0, %v2223_v51  ;;  %v1710_v44 = vmul.f32 %v1709_v30, %v3777_v35  ;;  %v1729_v45 = vsel %vm1728_vm5, %v2376_v52, %v1725_v9  ;;  %vm1731_vm6 = vcmp.eq.f32.partialorder %v1730_v46, 8.507059e+37 }
 0x27e   : > { %v1605_v47 = vadd.f32 %v3930_v26, %v1604_v58  ;;  %v1734_v6 = vsel %vm1731_vm6, %v1733_v57, %v1729_v45  ;;  %v1746_v60 = vmul.f32 %v1745_v40, %v3874_v23  ;;  %v3994_v2 = vadd.f32 1.0, %v1759_v29 }
 0x27f   : > { %v1449_v35 = vsel %vm3988_vm7, %v3865_v16, %v1445_v17  ;;  %vm1606_vm8 = vweird.f32 %v3886_v42  ;;  %v1612_v52 = vand.u32 2147483648, %v3886_v42  ;;  %v1735_v1 = vmul.f32 %v1734_v6, %v1710_v44 }
 0x280   : > { %v1893_v38 = vadd.f32 %v1892_v3, %v1891_v14  ;;  %v1902_v59 = vadd.f32 %v1901_v18, %v1900_v27  ;;  %v1610_v5 = vand.u32 2147483647, %v3886_v42  ;;  %2377 = vrcp.f32 %v3994_v2  ;;  %vm4012_vm10 = vmor %vm1606_vm8, %vm1607_vm3 }
 0x281   : > { %vm1451_vm9 = vcmp.eq.f32.partialorder %v1450_v8, 8.507059e+37  ;;  %v1453_v56 = vor.u32 1.1754944e-38, %v1452_v61  ;;  %v4008_v51 = vmul.f32 %v1788_v11, %v3877_v19  ;;  %v2227_v36 = vclamps-f32 %v1735_v1, 1.0 }
 0x282   : > { %v1828_v42 = vadd.f32 %v3961_v28, %v3690_v20  ;;  %v1589_v14 = vadd.f32 1.1283791, %v1588_v33  ;;  %v1609_v8 = vsel %vm4012_vm10, %v3930_v26, %v1605_v47  ;;  %v1747_v53 = vadd.f32 0.18741608, %v1746_v60 }
 0x283   : > { %v1454_v61 = vsel %vm1451_vm9, %v1453_v56, %v1449_v35  ;;  %v1613_v30 = vor.u32 1.1754944e-38, %v1612_v52  ;;  %v1120_v19 = vmul.f32 0.5, %v3766_v50  ;;  %v1792_v31 = vadd.f32 1.0, %v2227_v36 }
 0x284   : > { %v1430_v62 = vmul.f32 %v3882_v25, %v3540_v39  ;;  %v1894_v27 = vrot.slane %v1893_v38, 2  ;;  %v1903_v7 = vrot.slane %v1902_v59, 2  ;;  %vm1611_vm11 = vcmp.eq.f32.partialorder %v1610_v5, 8.507059e+37 }
 0x285   : > { %v1829_v46 = vadd.f32 %v1828_v42, %v4008_v51  ;;  %v1614_v17 = vsel %vm1611_vm11, %v1613_v30, %v1609_v8  ;;  %v4025_v58 = vmul.f32 %v1792_v31, %v1120_v19  ;;  %v1295_v26 = vmul.f32 %v3731_v43, %v3576_v63 }
 0x286   : > { %v2378_v40 = vpop.eup %2377  ;;  %v1455_v21 = vmul.f32 %v1454_v61, %v1430_v62  ;;  %v1590_v33 = vmul.f32 %v1589_v14, %v3734_v15  ;;  %v1748_v50 = vmul.f32 %v1747_v53, %v3874_v23  ;;  %v1895_v25 = vadd.f32 %v1894_v27, %v1893_v38 }
 0x287   : > { %v1830_v9 = vadd.f32 %v1829_v46, %v4025_v58  ;;  %v1762_v39 = vmul.f32 %v2378_v40, %v3994_v2  ;;  %v1904_v3 = vadd.f32 %v1903_v7, %v1902_v59  ;;  %v2216_v11 = vclamps-f32 %v1295_v26, 1.0 }
 0x288   : > { %v1615_v18 = vmul.f32 %v1614_v17, %v1590_v33  ;;  %v2220_v44 = vclamps-f32 %v1455_v21, 1.0  ;;  %v1749_v45 = vadd.f32 1.1283791, %v1748_v50  ;;  %v1772_v32 = vand.u32 2147483648, %v3994_v2 }
 0x289   : > { %v1831_v57 = vrot.slane %v1830_v9, 4  ;;  %v1763_v29 = vsub.f32 1.0, %v1762_v39  ;;  %vm1767_vm12 = vweird.f32 %v2378_v40  ;;  %v1770_v15 = vand.u32 2147483647, %v3994_v2 }
 0x28a   : > { %v1896_v23 = vrot.slane %v1895_v25, 1  ;;  %v1905_v47 = vrot.slane %v1904_v3, 1  ;;  %v2224_v6 = vclamps-f32 %v1615_v18, 1.0  ;;  %vm1766_vm13 = vweird.f32 %v3994_v2 }
 0x28b   : > { %v1832_v63 = vadd.f32 %v1831_v57, %v1830_v9  ;;  %v1764_v43 = vmul.f32 %v2378_v40, %v1763_v29  ;;  %v1781_v52 = vadd.f32 1.0, %v2216_v11  ;;  %v1113_v1 = vmul.f32 0.5, %v3520_v41  ;;  %vm1768_vm14 = vmor %vm1766_vm13, %vm1767_vm12  ;;  %v4067_v11 = vpop.permute.xlu2 %1974 }
 0x28c   : > { %v1785_v38 = vadd.f32 1.0, %v2220_v44  ;;  %v1773_v59 = vor.u32 1.1754944e-38, %v1772_v32  ;;  %v1750_v56 = vmul.f32 %v1749_v45, %v3829_v34  ;;  %vm1771_vm15 = vcmp.eq.f32.partialorder %v1770_v15, 8.507059e+37 }
 0x28d   : > { %v1833_v60 = vrot.slane %v1832_v63, 2  ;;  %v1765_v35 = vadd.f32 %v2378_v40, %v1764_v43  ;;  %v1897_v36 = vadd.f32 %v1896_v23, %v1895_v25  ;;  %v1906_v42 = vadd.f32 %v1905_v47, %v1904_v3 }
 0x28e   : > { %v1789_v14 = vadd.f32 1.0, %v2224_v6  ;;  %v1109_v30 = vmul.f32 0.5, %v3282_v49  ;;  %v4039_v2 = vmul.f32 %v1785_v38, %v1113_v1  ;;  %v1117_v41 = vmul.f32 0.5, %v3709_v22 }
 0x28f   : > { %v1834_v5 = vadd.f32 %v1833_v60, %v1832_v63  ;;  %v1769_v16 = vsel %vm1768_vm14, %v2378_v40, %v1765_v35  ;;  %v1925_v34 = vmul.f32 %v1897_v36, %v3871_v48  ;;  %v1926_v7 = vmul.f32 %v1906_v42, %v3871_v48 }
 0x290   : > { %v1774_v8 = vsel %vm1771_vm15, %v1773_v59, %v1769_v16  ;;  %v1797_v62 = vmul.f32 %v1781_v52, %v1109_v30  ;;  %v1805_v27 = vmul.f32 %v1789_v14, %v1117_v41  ;;  %v1121_v26 = vmul.f32 0.5, %v3813_v54  ;;  %v4076_v30 = vpop.permute.xlu0 %1978 }
 0x291   : > { %v1835_v53 = vrot.slane %v1834_v5, 1  ;;  %v1775_v61 = vmul.f32 %v1774_v8, %v1750_v56  ;;  %v1929_v49 = vadd.f32 1e-05, %v1925_v34  ;;  %v1930_v21 = vadd.f32 1e-05, %v1926_v7 }
 0x292   : > { %v1837_v40 = vadd.f32 %v4039_v2, %v1797_v62 }
 0x293   : > { %v1836_v19 = vadd.f32 %v1835_v53, %v1834_v5  ;;  %v2228_v31 = vclamps-f32 %v1775_v61, 1.0  ;;  %2379 = vrsqrt.f32 %v1929_v49  ;;  %v4071_v16 = vpop.permute.xlu2 %1986  ;;  %vm1939_vm1 = vweird.f32 %v1929_v49 }
 0x294   : > { %v1838_v9 = vadd.f32 %v1837_v40, %v1805_v27  ;;  %2381 = vrsqrt.f32 %v1930_v21  ;;  %vm1949_vm4 = vweird.f32 %v1930_v21 }
 0x295   : > { %v1855_v46 = vmul.f32 %v3871_v48, %v1836_v19  ;;  %v1793_v17 = vadd.f32 1.0, %v2228_v31 }
 0x297   : > { %v4048_v33 = vsub.f32 %v3690_v20, %v1855_v46  ;;  %v4051_v22 = vsub.f32 %v3961_v28, %v1855_v46  ;;  %v4054_v50 = vsub.f32 %v4008_v51, %v1855_v46  ;;  %v1809_v39 = vmul.f32 %v1793_v17, %v1121_v26 }
 0x298   : > { %v4057_v25 = vsub.f32 %v4025_v58, %v1855_v46  ;;  %v4069_v58 = vpop.permute.xlu1 %1982 }
 0x299   : > { %v1875_v54 = vmul.f32 %v4048_v33, %v4048_v33  ;;  %v1879_v3 = vmul.f32 %v4051_v22, %v4051_v22  ;;  %v1839_v20 = vadd.f32 %v1838_v9, %v1809_v39  ;;  %v1883_v28 = vmul.f32 %v4054_v50, %v4054_v50  ;;  %v2380_v44 = vpop.eup %2379 }
 0x29a   : > { %v1887_v57 = vmul.f32 %v4057_v25, %v4057_v25  ;;  %v1934_v63 = vmul.f32 %v2380_v44, %v1929_v49  ;;  %v2382_v43 = vpop.eup %2381  ;;  %vm1940_vm0 = vweird.f32 %v2380_v44 }
 0x29b   : > { %v1907_v18 = vadd.f32 %v1879_v3, %v1875_v54  ;;  %v1840_v51 = vrot.slane %v1839_v20, 4  ;;  %v1944_v6 = vmul.f32 %v2382_v43, %v1930_v21  ;;  %vm1950_vm2 = vweird.f32 %v2382_v43  ;;  %vm1941_vm3 = vmor %vm1939_vm1, %vm1940_vm0 }
 0x29c   : > { %v1935_v47 = vmul.f32 %v2380_v44, %v1934_v63  ;;  %vm1951_vm5 = vmor %vm1949_vm4, %vm1950_vm2 }
 0x29d   : > { %v1908_v29 = vadd.f32 %v1907_v18, %v1883_v28  ;;  %v1841_v45 = vadd.f32 %v1840_v51, %v1839_v20  ;;  %v1945_v1 = vmul.f32 %v2382_v43, %v1944_v6 }
 0x29e   : > { %v1936_v52 = vmul.f32 0.5, %v1935_v47 }
 0x29f   : > { %v1909_v32 = vadd.f32 %v1908_v29, %v1887_v57  ;;  %v1842_v15 = vrot.slane %v1841_v45, 2  ;;  %v1946_v56 = vmul.f32 0.5, %v1945_v1 }
 0x2a0   : > { %v1937_v5 = vsub.f32 1.5, %v1936_v52  ;;  %v4073_v36 = vpop.permute.xlu1 %2022 }
 0x2a1   : > { %v1910_v23 = vrot.slane %v1909_v32, 4  ;;  %v1843_v60 = vadd.f32 %v1842_v15, %v1841_v45  ;;  %v1947_v53 = vsub.f32 1.5, %v1946_v56 }
 0x2a2   : > { %v1938_v8 = vmul.f32 %v2380_v44, %v1937_v5 }
 0x2a3   : > { %v1911_v35 = vadd.f32 %v1910_v23, %v1909_v32  ;;  %v1844_v38 = vrot.slane %v1843_v60, 1  ;;  %v1948_v31 = vmul.f32 %v2382_v43, %v1947_v53  ;;  %v4107_v32 = vpop.permute.xlu2 %2026 }
 0x2a4   : > { %v1942_v19 = vsel %vm1941_vm3, %v2380_v44, %v1938_v8 }
 0x2a5   : > { %v1912_v59 = vrot.slane %v1911_v35, 2  ;;  %v1845_v42 = vadd.f32 %v1844_v38, %v1843_v60  ;;  %v1952_v26 = vsel %vm1951_vm5, %v2382_v43, %v1948_v31  ;;  %v1989_v49 = vmul.f32 %v4067_v11, %v1942_v19 }
 0x2a6   : > { %v1997_v9 = vmul.f32 %v4069_v58, %v1942_v19  ;;  %v1998_v3 = vmul.f32 %v4069_v58, %v1952_v26  ;;  %v2001_v20 = vmul.f32 %v4071_v16, %v1942_v19  ;;  %v2002_v18 = vmul.f32 %v4071_v16, %v1952_v26 }
 0x2a7   : > { %v1913_v14 = vadd.f32 %v1912_v59, %v1911_v35  ;;  %v1856_v61 = vmul.f32 %v3871_v48, %v1845_v42  ;;  %v2005_v51 = vmul.f32 %v1989_v49, %v3896_v55  ;;  %v1993_v57 = vmul.f32 %v4076_v30, %v1942_v19 }
 0x2a8   : > { %v1994_v45 = vmul.f32 %v4076_v30, %v1952_v26  ;;  %v4109_v63 = vpop.permute.xlu1 %2034  ;;  %v2017_v43 = vmul.f32 %v2001_v20, %v3946_v24  ;;  %v2018_v55 = vmul.f32 %v2002_v18, %v3954_v10  ;;  %v4122_v10 = vpop.permute.xlu0 %2030  ;;  %v2013_v52 = vmul.f32 %v1997_v9, %v3926_v12 }
 0x2a9   : > { %v1914_v41 = vrot.slane %v1913_v14, 1  ;;  %v4078_v34 = vsub.f32 %v1797_v62, %v1856_v61  ;;  %v4081_v7 = vsub.f32 %v4039_v2, %v1856_v61  ;;  %v4083_v46 = vsub.f32 %v1805_v27, %v1856_v61 }
 0x2aa   : > { %v4085_v17 = vsub.f32 %v1809_v39, %v1856_v61  ;;  %v1990_v39 = vmul.f32 %v4067_v11, %v1952_v26  ;;  %v2037_v23 = vadd.f32 %v4073_v36, %v2005_v51  ;;  %v2009_v47 = vmul.f32 %v1993_v57, %v3899_v0 }
 0x2ab   : > { %v1915_v40 = vadd.f32 %v1914_v41, %v1913_v14  ;;  %v1876_v54 = vmul.f32 %v4078_v34, %v4078_v34  ;;  %v1880_v62 = vmul.f32 %v4081_v7, %v4081_v7  ;;  %v1884_v2 = vmul.f32 %v4083_v46, %v4083_v46 }
 0x2ac   : > { %v1888_v27 = vmul.f32 %v4085_v17, %v4085_v17  ;;  %v2006_v44 = vmul.f32 %v1990_v39, %v3936_v37  ;;  %v2010_v37 = vmul.f32 %v1994_v45, %v3939_v4  ;;  %2053 = vst [vmem:[%s4117_s11] sm:$0xff] %v2037_v23  ;;  %v2041_v24 = vadd.f32 %v4107_v32, %v2009_v47 }
 0x2ad   : > { %v1927_v21 = vmul.f32 %v1915_v40, %v3871_v48  ;;  %v1916_v28 = vadd.f32 %v1880_v62, %v1876_v54  ;;  %v2049_v0 = vadd.f32 %v4109_v63, %v2017_v43  ;;  %v2050_v35 = vadd.f32 %v4109_v63, %v2018_v55 }
 0x2ae   : > { %v2038_v6 = vadd.f32 %v4073_v36, %v2006_v44  ;;  %v2042_v4 = vadd.f32 %v4107_v32, %v2010_v37  ;;  %v2014_v1 = vmul.f32 %v1998_v3, %v3942_v13  ;;  %2057 = vst [vmem:[%s4117_s11 + $0x20] sm:$0xff] %v2041_v24  ;;  %v2045_v59 = vadd.f32 %v4122_v10, %v2013_v52 }
 0x2af   : > { %v1931_v29 = vadd.f32 1e-05, %v1927_v21  ;;  %v1917_v15 = vadd.f32 %v1916_v28, %v1884_v2  ;;  %2065 = vst [vmem:[%s4117_s11 + $0x60] sm:$0xff] %v2049_v0 }
 0x2b0   : > { %2054 = vst [vmem:[%s4117_s11 + $0x8] sm:$0xff] %v2038_v6  ;;  %v2046_v5 = vadd.f32 %v4122_v10, %v2014_v1 }
 0x2b1   : > { %2383 = vrsqrt.f32 %v1931_v29  ;;  %v1918_v60 = vadd.f32 %v1917_v15, %v1888_v27  ;;  %2058 = vst [vmem:[%s4117_s11 + $0x28] sm:$0xff] %v2042_v4  ;;  %vm1959_vm7 = vweird.f32 %v1931_v29 }
 0x2b2   : > { %2066 = vst [vmem:[%s4117_s11 + $0x68] sm:$0xff] %v2050_v35 }
 0x2b3   : > { %v1919_v38 = vrot.slane %v1918_v60, 4  ;;  %2061 = vst [vmem:[%s4117_s11 + $0x40] sm:$0xff] %v2045_v59 }
 0x2b4   : > { %2062 = vst [vmem:[%s4117_s11 + $0x48] sm:$0xff] %v2046_v5 }
 0x2b5   : > { %v1920_v56 = vadd.f32 %v1919_v38, %v1918_v60 }
 0x2b7   : > { %v2384_v42 = vpop.eup %2383  ;;  %v1921_v14 = vrot.slane %v1920_v56, 2 }
 0x2b8   : > { %v1954_v8 = vmul.f32 %v2384_v42, %v1931_v29  ;;  %vm1960_vm6 = vweird.f32 %v2384_v42 }
 0x2b9   : > { %v1922_v53 = vadd.f32 %v1921_v14, %v1920_v56  ;;  %vm1961_vm8 = vmor %vm1959_vm7, %vm1960_vm6 }
 0x2ba   : > { %v1955_v61 = vmul.f32 %v2384_v42, %v1954_v8 }
 0x2bb   : > { %v1923_v12 = vrot.slane %v1922_v53, 1 }
 0x2bc   : > { %v1956_v41 = vmul.f32 0.5, %v1955_v61 }
 0x2bd   : > { %v1924_v13 = vadd.f32 %v1923_v12, %v1922_v53 }
 0x2be   : > { %v1957_v19 = vsub.f32 1.5, %v1956_v41 }
 0x2bf   : > { %v1928_v31 = vmul.f32 %v1924_v13, %v3871_v48 }
 0x2c0   : > { %v1958_v40 = vmul.f32 %v2384_v42, %v1957_v19 }
 0x2c1   : > { %v1932_v26 = vadd.f32 1e-05, %v1928_v31 }
 0x2c2   : > { %v1962_v49 = vsel %vm1961_vm8, %v2384_v42, %v1958_v40 }
 0x2c3   : > { %v1991_v9 = vmul.f32 %v4067_v11, %v1962_v49  ;;  %v1999_v54 = vmul.f32 %v4069_v58, %v1962_v49  ;;  %v2003_v62 = vmul.f32 %v4071_v16, %v1962_v49  ;;  %v1995_v2 = vmul.f32 %v4076_v30, %v1962_v49 }
 0x2c4   : > { %2385 = vrsqrt.f32 %v1932_v26  ;;  %vm1969_vm10 = vweird.f32 %v1932_v26 }
 0x2c5   : > { %v2007_v48 = vmul.f32 %v1991_v9, %v4048_v33  ;;  %v2011_v27 = vmul.f32 %v1995_v2, %v4051_v22  ;;  %v2019_v21 = vmul.f32 %v2003_v62, %v4057_v25  ;;  %v2015_v39 = vmul.f32 %v1999_v54, %v4054_v50 }
 0x2c7   : > { %v2039_v3 = vadd.f32 %v4073_v36, %v2007_v48  ;;  %v2043_v20 = vadd.f32 %v4107_v32, %v2011_v27  ;;  %v2051_v28 = vadd.f32 %v4109_v63, %v2019_v21  ;;  %v2047_v18 = vadd.f32 %v4122_v10, %v2015_v39 }
 0x2c9   : > { %2055 = vst [vmem:[%s4117_s11 + $0x10] sm:$0xff] %v2039_v3 }
 0x2ca   : > { %v2386_v51 = vpop.eup %2385  ;;  %2059 = vst [vmem:[%s4117_s11 + $0x30] sm:$0xff] %v2043_v20 }
 0x2cb   : > { %v1964_v57 = vmul.f32 %v2386_v51, %v1932_v26  ;;  %2067 = vst [vmem:[%s4117_s11 + $0x70] sm:$0xff] %v2051_v28  ;;  %vm1970_vm9 = vweird.f32 %v2386_v51 }
 0x2cc   : > { %2063 = vst [vmem:[%s4117_s11 + $0x50] sm:$0xff] %v2047_v18  ;;  %vm1971_vm11 = vmor %vm1969_vm10, %vm1970_vm9 }
 0x2cd   : > { %v1965_v33 = vmul.f32 %v2386_v51, %v1964_v57 }
 0x2cf   : > { %v1966_v22 = vmul.f32 0.5, %v1965_v33 }
 0x2d1   : > { %v1967_v25 = vsub.f32 1.5, %v1966_v22 }
 0x2d3   : > { %v1968_v50 = vmul.f32 %v2386_v51, %v1967_v25 }
 0x2d5   : > { %v1972_v29 = vsel %vm1971_vm11, %v2386_v51, %v1968_v50 }
 0x2d6   : > { %v1992_v44 = vmul.f32 %v4067_v11, %v1972_v29  ;;  %v2000_v45 = vmul.f32 %v4069_v58, %v1972_v29  ;;  %v2004_v43 = vmul.f32 %v4071_v16, %v1972_v29  ;;  %v1996_v15 = vmul.f32 %v4076_v30, %v1972_v29 }
 0x2d8   : > { %v2008_v23 = vmul.f32 %v1992_v44, %v4078_v34  ;;  %v2012_v47 = vmul.f32 %v1996_v15, %v4081_v7  ;;  %v2020_v11 = vmul.f32 %v2004_v43, %v4085_v17  ;;  %v2016_v58 = vmul.f32 %v2000_v45, %v4083_v46 }
 0x2da   : > { %v2040_v16 = vadd.f32 %v4073_v36, %v2008_v23  ;;  %v2044_v30 = vadd.f32 %v4107_v32, %v2012_v47  ;;  %v2052_v55 = vadd.f32 %v4109_v63, %v2020_v11  ;;  %v2048_v6 = vadd.f32 %v4122_v10, %v2016_v58 }
 0x2dc   : > { %2056 = vst [vmem:[%s4117_s11 + $0x18] sm:$0xff] %v2040_v16 }
 0x2dd   : > { %2060 = vst [vmem:[%s4117_s11 + $0x38] sm:$0xff] %v2044_v30 }
 0x2de   : > { %2068 = vst [vmem:[%s4117_s11 + $0x78] sm:$0xff] %v2052_v55 }
 0x2df   : > { %2064 = vst [vmem:[%s4117_s11 + $0x58] sm:$0xff] %v2048_v6 }
 0x2e0   : > { %2445 = shalt.err (!%p2442_p13)
}
 0x2e1   : > { %s2509_s28 = smov 512   ;;  %s2510_s11 = smov 32  }
 0x2e2   : > { %2240 = dma.vmem_to_hbm [thread:$0]  (%p2592_p9), %s2085_s21, 2048, %s2087_s14, %s2070_s15, %s2509_s28, %s2509_s28, %s2510_s11  }
 0x2e3 PF: > { %s2101_s30 = sand.u32 1, %s2480_s18   ;;  %p2247_p0 = pnand %p2177_p12, %p2599_p11 }
 0x2e4   : > { %s2102_s9 = scalar_lea.sflag [#allocation4], %s2101_s30 }
 0x2e5   : > { %p2248_p1 = pneg %p2247_p0 }
 0x2e7   : > { %2475 = dma.done.wait (%p2248_p1), %s2102_s9, 2048  }
 0x2e8   : > { %2477 = vsyncadd (%p2248_p1), %s2102_s9, 4294965248  ;;  %s21_s23 = sadd.s32 1, %s2500_s23   ;;  %s4263_s18 = smov %s2484_s19 }
 0x2e9   : > { %p18_p2 = scmp.ge.s32.totalorder %s21_s23, 4   ;;  %s4264_s19 = smov %s2488_s20 }
 0x2ea   : > { %s4265_s20 = smov %s2597_s7  ;;  %s4266_s21 = smov %s2496_s22 }
 0x2eb   : > { %s4267_s22 = smov %s4269_s26  ;;  %20 = sbr.rel (!%p18_p2) target bundleno = 6 (0x6), region = 85 }
 0x2f0   :  { %2108 = vsyncpa [#allocation3], 1 }
 0x2f1   :  { %2110 = vsyncpa [#allocation3 + $0x1], 1 }
 0x2f2   :  { %2111 = vsyncpa [#allocation4], 1 }
 0x2f3   :  { %2113 = vsyncpa [#allocation4 + $0x1], 1 }

</bundles_post_ra>
